<compile_context>
chip_gen: v7x
topology: tpu7x:2x2x1
jax: 0.10.0
libtpu: 0.0.40
codegen_flags: <defaults>
</compile_context>

<pallas_src>
import functools

import jax
import jax.numpy as jnp
from jax.experimental import pallas as pl
from jax.experimental.pallas import tpu as pltpu

LN_EPS = 1e-5
BN_EPS = 1e-5


def _round_up(n: int, m: int) -> int:
    return ((n + m - 1) // m) * m


def _chip_defaults():
    """(default tile_t, vmem_limit_bytes) chosen per TPU generation."""
    vmem_cap = 128 * 1024 * 1024
    try:
        info = pltpu.get_tpu_info()
        vmem_cap = int(getattr(info, "vmem_capacity_bytes", vmem_cap))
    except Exception:
        pass
    if vmem_cap <= 64 * 1024 * 1024:            # v7x-class: 64 MiB per TensorCore
        return 256, 48 * 1024 * 1024
    return 512, 96 * 1024 * 1024                # v5e / v6e: 128 MiB VMEM


def prepare_conformer_conv_params(params, hidden_size):
    """One-time weight preprocessing (call at model-load time, NOT per forward).

    PyTorch layouts in:  w1 (2H,H), w2 (H,H), wdw (H,K), BN running stats (H,).
    Produces bf16 matmul weights, transposed to (in, out), and folds eval-mode
    BatchNorm into the depthwise weights + a single bias.
    """
    H = hidden_size
    w1 = jnp.asarray(params["w1"])                                       # (2H, H)
    scale = params["bn_g"] / jnp.sqrt(params["bn_rv"] + BN_EPS)          # (H,)
    return {
        "w1a": jnp.asarray(w1[:H].T, jnp.bfloat16),                      # (H, H) value half
        "w1b": jnp.asarray(w1[H:].T, jnp.bfloat16),                      # (H, H) gate half
        "w2": jnp.asarray(params["w2"].T, jnp.bfloat16),                 # (H, H)
        "wdw": jnp.asarray((params["wdw"] * scale[:, None]).T, jnp.float32),  # (K, H)
        "bias": (params["bn_b"] - params["bn_rm"] * scale).reshape(1, H).astype(jnp.float32),
        "ln_g": params["ln_g"].reshape(1, H).astype(jnp.float32),
        "ln_b": params["ln_b"].reshape(1, H).astype(jnp.float32),
    }


def _conformer_conv_kernel(
    x_ref,      # (1, tile_t, H)       center rows of the time tile
    hl_ref,     # (1, 1, halo, H)      left halo rows (zeros outside the sequence)
    hr_ref,     # (1, 1, halo, H)      right halo rows (zeros outside the sequence)
    ln_g_ref,   # (1, H)               LayerNorm gamma
    ln_b_ref,   # (1, H)               LayerNorm beta
    w1a_ref,    # (H, H) bf16          pointwise_conv1, GLU "value" half (in, out)
    w1b_ref,    # (H, H) bf16          pointwise_conv1, GLU "gate"  half (in, out)
    wdw_ref,    # (K, H) f32           depthwise weights with BN scale folded in
    bias_ref,   # (1, H) f32           folded BN bias
    w2_ref,     # (H, H) bf16          pointwise_conv2 (in, out)
    o_ref,      # (1, tile_t, H)
    *,
    seq_len: int,
    tile_t: int,
    halo: int,
    pad: int,
    ksize: int,
):
    t = pl.program_id(1)
    win = tile_t + 2 * halo

    # Assemble the halo'd window; concat offsets (0, halo, halo+tile_t) are all
    # multiples of 8, so these are aligned sublane copies.
    xw = jnp.concatenate(
        [hl_ref[0, 0].astype(jnp.float32),
         x_ref[0].astype(jnp.float32),
         hr_ref[0, 0].astype(jnp.float32)],
        axis=0,
    )                                                      # (win, H)

    # ---- LayerNorm over H (f32 on the VPU) ---------------------------------
    mean = jnp.mean(xw, axis=-1, keepdims=True)
    var = jnp.mean(jnp.square(xw - mean), axis=-1, keepdims=True)
    xn = (xw - mean) * jax.lax.rsqrt(var + LN_EPS)
    xn = xn * ln_g_ref[...] + ln_b_ref[...]

    # ---- pointwise_conv1 + GLU (two bf16 MXU matmuls, f32 accumulation) ----
    xn_bf = xn.astype(jnp.bfloat16)
    a = jnp.dot(xn_bf, w1a_ref[...], preferred_element_type=jnp.float32)
    g = jnp.dot(xn_bf, w1b_ref[...], preferred_element_type=jnp.float32)
    glu = a * jax.nn.sigmoid(g)                            # (win, H)

    # Zero rows outside the real sequence: realizes the zero 'SAME' padding of
    # the depthwise conv and masks the padded tail of T.  Do NOT remove: LN of
    # zero halo rows yields beta-driven nonzero GLU values that would otherwise
    # leak into the depthwise taps of valid rows.
    row = jax.lax.broadcasted_iota(jnp.int32, (win, 1), 0)
    gidx = t * tile_t - halo + row
    glu = jnp.where((gidx >= 0) & (gidx < seq_len), glu, 0.0)

    # ---- depthwise conv (BN folded into wdw) --------------------------------
    # At most 7 pltpu.roll calls total: decompose each tap's window offset
    # off_k = halo + k - pad into an 8-aligned base (off_k // 8 * 8, realized as
    # a static sublane-aligned slice) plus a sub-8 residue (one roll per
    # distinct residue).  Accumulate directly into a (tile_t, H) accumulator.
    # No wraparound: halo >= pad guarantees off_k + tile_t - 1 <= win - 1.
    wdw = wdw_ref[...]                                     # (K, H)
    groups = {}                                            # residue -> [(k, base)]
    for k in range(ksize):
        off = halo + k - pad                               # in [halo-pad, halo+pad]
        groups.setdefault(off % 8, []).append((k, (off // 8) * 8))
    acc = None
    for r, taps in groups.items():                         # static unroll
        # rolled[j] == glu[j + r] for all rows used below.
        rolled = glu if r == 0 else pltpu.roll(glu, win - r, 0)
        for k, base in taps:                               # base % 8 == 0, static
            term = rolled[base:base + tile_t, :] * wdw[k:k + 1, :]
            acc = term if acc is None else acc + term
    dw = acc + bias_ref[...]                               # (tile_t, H)

    # ---- swish activation + pointwise_conv2 --------------------------------
    act = dw * jax.nn.sigmoid(dw)
    out = jnp.dot(act.astype(jnp.bfloat16), w2_ref[...],
                  preferred_element_type=jnp.float32)

    # Dropout: identity at inference.
    o_ref[...] = out[None, :, :].astype(o_ref.dtype)


def conformer_conv_module(x, prepared, *, kernel_size: int, tile_t=None,
                          vmem_limit_bytes=None):
    """x: (B, T, H) -> (B, T, H).  `prepared` = prepare_conformer_conv_params(...)."""
    if kernel_size % 2 != 1:
        raise ValueError("conv_depthwise_kernel_size must be odd for 'SAME' padding")
    B, T, H = x.shape
    K = kernel_size
    pad = (K - 1) // 2
    halo = max(8, _round_up(pad, 8))                  # sublane-aligned halo
    assert halo >= pad, "depthwise roll decomposition requires halo >= pad"

    default_tt, default_vmem = _chip_defaults()
    if tile_t is None:
        tile_t = default_tt
    if vmem_limit_bytes is None:
        vmem_limit_bytes = default_vmem

    tt = _round_up(min(tile_t, T), 8)
    tt = max(tt, halo)
    n_t = -(-T // tt)
    t_round = n_t * tt
    win = tt + 2 * halo

    # ---- center tiles + per-tile halo rows ----------------------------------
    # Halos are carved out of the single tail-padded copy of x (only halo rows
    # per tile are copied), instead of materializing full padded copies in HBM.
    x_c = jnp.pad(x, ((0, 0), (0, t_round - T), (0, 0))) if t_round != T else x
    xr4 = x_c.reshape(B, n_t, tt, H)
    zero_halo = jnp.zeros((B, 1, halo, H), x.dtype)
    # left halo of tile t = rows [t*tt - halo, t*tt); zeros for t == 0
    x_l = jnp.concatenate([zero_halo, xr4[:, :-1, tt - halo:, :]], axis=1)
    # right halo of tile t = rows [(t+1)*tt, (t+1)*tt + halo); zeros for last tile
    x_r = jnp.concatenate([xr4[:, 1:, :halo, :], zero_halo], axis=1)

    kernel = functools.partial(
        _conformer_conv_kernel,
        seq_len=T, tile_t=tt, halo=halo, pad=pad, ksize=K,
    )

    cost = pl.CostEstimate(
        flops=int(B * n_t * (4 * win * H * H + 2 * tt * H * H + 2 * tt * H * K)),
        transcendentals=int(B * n_t * (win + tt) * H),
        bytes_accessed=int(4 * (x_c.size + x_l.size + x_r.size + B * t_round * H)
                           + 2 * 3 * H * H + 4 * (K + 3) * H),
    )

    def run(weight_mode, vmem_limit):
        def const(shape):
            kwargs = {} if weight_mode is None else {"pipeline_mode": weight_mode}
            return pl.BlockSpec(shape, lambda b, t: (0,) * len(shape), **kwargs)

        return pl.pallas_call(
            kernel,
            out_shape=jax.ShapeDtypeStruct((B, t_round, H), x.dtype),
            grid_spec=pltpu.PrefetchScalarGridSpec(
                num_scalar_prefetch=0,
                grid=(B, n_t),
                in_specs=[
                    pl.BlockSpec((1, tt, H), lambda b, t: (b, t, 0)),          # x center
                    pl.BlockSpec((1, 1, halo, H), lambda b, t: (b, t, 0, 0)),  # left halo
                    pl.BlockSpec((1, 1, halo, H), lambda b, t: (b, t, 0, 0)),  # right halo
                    const((1, H)),                 # ln gamma
                    const((1, H)),                 # ln beta
                    const((H, H)),                 # w1a (bf16)
                    const((H, H)),                 # w1b (bf16)
                    const((K, H)),                 # depthwise weights * bn scale
                    const((1, H)),                 # folded bn bias
                    const((H, H)),                 # w2 (bf16)
                ],
                out_specs=pl.BlockSpec((1, tt, H), lambda b, t: (b, t, 0)),
            ),
            compiler_params=pltpu.CompilerParams(
                dimension_semantics=("parallel", "parallel"),
                vmem_limit_bytes=vmem_limit,
            ),
            cost_estimate=cost,
        )(x_c, x_l, x_r, prepared["ln_g"], prepared["ln_b"], prepared["w1a"],
          prepared["w1b"], prepared["wdw"], prepared["bias"], prepared["w2"])

    try:
        # Constant weights never change block index -> single-buffer them to
        # save VMEM (frees ~half the weight footprint; matters most on v7x).
        out = run(pl.Buffered(1), vmem_limit_bytes)
    except Exception:
        # Conservative fallback if pipeline_mode=Buffered(1) or the requested
        # VMEM limit is rejected by this JAX / chip combination.
        out = run(None, min(vmem_limit_bytes, 48 * 1024 * 1024))

    return out[:, :T, :] if t_round != T else out


def _reference(x, params, *, kernel_size: int):
    """Pure-JAX f32 replica of the PyTorch forward (eval mode) for verification."""
    B, T, H = x.shape
    mean = x.mean(-1, keepdims=True)
    var = ((x - mean) ** 2).mean(-1, keepdims=True)
    ln = (x - mean) / jnp.sqrt(var + LN_EPS) * params["ln_g"] + params["ln_b"]
    y = jnp.einsum("bth,oh->bto", ln, params["w1"])               # (B, T, 2H)
    glu = y[..., :H] * jax.nn.sigmoid(y[..., H:])
    pad = (kernel_size - 1) // 2
    xp = jnp.pad(glu, ((0, 0), (pad, pad), (0, 0)))
    dw = sum(xp[:, k:k + T, :] * params["wdw"][:, k] for k in range(kernel_size))
    bn = (dw - params["bn_rm"]) / jnp.sqrt(params["bn_rv"] + BN_EPS)
    bn = bn * params["bn_g"] + params["bn_b"]
    act = bn * jax.nn.sigmoid(bn)
    return jnp.einsum("bth,oh->bto", act, params["w2"])


if __name__ == "__main__":
    B, T, H, K = 2, 16, 32, 5          # K odd, as the module requires
    key = jax.random.PRNGKey(0)
    ks = jax.random.split(key, 12)

    x = jax.random.normal(ks[0], (B, T, H), jnp.float32)
    params = {
        "ln_g": 1.0 + 0.1 * jax.random.normal(ks[1], (H,), jnp.float32),
        "ln_b": 0.1 * jax.random.normal(ks[2], (H,), jnp.float32),
        "w1": 0.1 * jax.random.normal(ks[3], (2 * H, H), jnp.float32),   # (out, in)
        "wdw": 0.2 * jax.random.normal(ks[4], (H, K), jnp.float32),      # (chan, tap)
        "bn_rm": 0.1 * jax.random.normal(ks[5], (H,), jnp.float32),
        "bn_rv": 0.5 + jax.random.uniform(ks[6], (H,), jnp.float32),
        "bn_g": 1.0 + 0.1 * jax.random.normal(ks[7], (H,), jnp.float32),
        "bn_b": 0.1 * jax.random.normal(ks[8], (H,), jnp.float32),
        "w2": 0.1 * jax.random.normal(ks[9], (H, H), jnp.float32),       # (out, in)
    }

    # One-time weight preprocessing (model-load time), not per forward call.
    prepared = jax.tree_util.tree_map(jax.block_until_ready,
                                      prepare_conformer_conv_params(params, H))

    ref = _reference(x, params, kernel_size=K)

    # Single time tile (per-chip default tiling).
    out = jax.block_until_ready(conformer_conv_module(x, prepared, kernel_size=K))
    assert out.shape == (B, T, H)
    assert jnp.allclose(out, ref, atol=3e-2, rtol=3e-2), "mismatch (single tile)"

    # Multi-tile path: exercises halo rows, boundary masking, the 2-D grid and
    # several distinct roll residues / base offsets in the depthwise loop.
    out_mt = jax.block_until_ready(
        conformer_conv_module(x, prepared, kernel_size=K, tile_t=8))
    assert jnp.allclose(out_mt, ref, atol=3e-2, rtol=3e-2), "mismatch (multi tile)"

    # Ragged T (not a multiple of the tile) with a different kernel size.
    T2, K2 = 20, 3
    x2 = jax.random.normal(ks[10], (1, T2, H), jnp.float32)
    params2 = dict(params, wdw=0.2 * jax.random.normal(ks[11], (H, K2), jnp.float32))
    prepared2 = prepare_conformer_conv_params(params2, H)
    ref2 = _reference(x2, params2, kernel_size=K2)
    out2 = jax.block_until_ready(
        conformer_conv_module(x2, prepared2, kernel_size=K2, tile_t=8))
    assert out2.shape == (1, T2, H)
    assert jnp.allclose(out2, ref2, atol=3e-2, rtol=3e-2), "mismatch (ragged T)"

    print("KERNEL_OK")
</pallas_src>

<mosaic_0001>
module attributes {stable_mosaic.version = 11 : i64} {
  func.func @_conformer_conv_kernel(%arg0: i32, %arg1: i32, %arg2: memref<1x16x32xf32, #tpu.memory_space<vmem>>, %arg3: memref<1x1x8x32xf32, #tpu.memory_space<vmem>>, %arg4: memref<1x1x8x32xf32, #tpu.memory_space<vmem>>, %arg5: memref<1x32xf32, #tpu.memory_space<vmem>>, %arg6: memref<1x32xf32, #tpu.memory_space<vmem>>, %arg7: memref<32x32xbf16, #tpu.memory_space<vmem>>, %arg8: memref<32x32xbf16, #tpu.memory_space<vmem>>, %arg9: memref<5x32xf32, #tpu.memory_space<vmem>>, %arg10: memref<1x32xf32, #tpu.memory_space<vmem>>, %arg11: memref<32x32xbf16, #tpu.memory_space<vmem>>, %arg12: memref<1x16x32xf32, #tpu.memory_space<vmem>>) attributes {dimension_semantics = [#tpu.dimension_semantics<parallel>, #tpu.dimension_semantics<parallel>], iteration_bounds = array<i64: 2, 1>, scalar_prefetch = 0 : i64, scratch_operands = 0 : i64, tpu.core_type = #tpu.core_type<tc>, window_params = [{transform_indices = @transform_0, window_bounds = array<i64: 1, 16, 32>}, {transform_indices = @transform_1, window_bounds = array<i64: 1, 1, 8, 32>}, {transform_indices = @transform_2, window_bounds = array<i64: 1, 1, 8, 32>}, {pipeline_mode = #tpu.pipeline_mode<synchronous>, transform_indices = @transform_3, window_bounds = array<i64: 1, 32>}, {pipeline_mode = #tpu.pipeline_mode<synchronous>, transform_indices = @transform_4, window_bounds = array<i64: 1, 32>}, {pipeline_mode = #tpu.pipeline_mode<synchronous>, transform_indices = @transform_5, window_bounds = array<i64: 32, 32>}, {pipeline_mode = #tpu.pipeline_mode<synchronous>, transform_indices = @transform_6, window_bounds = array<i64: 32, 32>}, {pipeline_mode = #tpu.pipeline_mode<synchronous>, transform_indices = @transform_7, window_bounds = array<i64: 5, 32>}, {pipeline_mode = #tpu.pipeline_mode<synchronous>, transform_indices = @transform_8, window_bounds = array<i64: 1, 32>}, {pipeline_mode = #tpu.pipeline_mode<synchronous>, transform_indices = @transform_9, window_bounds = array<i64: 32, 32>}, {transform_indices = @transform_10, window_bounds = array<i64: 1, 16, 32>}]} {
    %c0 = arith.constant 0 : index
    %c0_0 = arith.constant 0 : index
    %c0_1 = arith.constant 0 : index
    %c0_2 = arith.constant 0 : index
    %0 = vector.load %arg3[%c0, %c0_0, %c0_1, %c0_2] : memref<1x1x8x32xf32, #tpu.memory_space<vmem>>, vector<1x1x8x32xf32>
    %1 = vector.shape_cast %0 : vector<1x1x8x32xf32> to vector<8x32xf32>
    %c0_3 = arith.constant 0 : index
    %c0_4 = arith.constant 0 : index
    %c0_5 = arith.constant 0 : index
    %2 = vector.load %arg2[%c0_3, %c0_4, %c0_5] : memref<1x16x32xf32, #tpu.memory_space<vmem>>, vector<1x16x32xf32>
    %3 = vector.shape_cast %2 : vector<1x16x32xf32> to vector<16x32xf32>
    %c0_6 = arith.constant 0 : index
    %c0_7 = arith.constant 0 : index
    %c0_8 = arith.constant 0 : index
    %c0_9 = arith.constant 0 : index
    %4 = vector.load %arg4[%c0_6, %c0_7, %c0_8, %c0_9] : memref<1x1x8x32xf32, #tpu.memory_space<vmem>>, vector<1x1x8x32xf32>
    %5 = vector.shape_cast %4 : vector<1x1x8x32xf32> to vector<8x32xf32>
    %6 = tpu.concatenate %1, %3, %5 in 0 : vector<8x32xf32>, vector<16x32xf32>, vector<8x32xf32> -> vector<32x32xf32>
    %cst = arith.constant dense<0.000000e+00> : vector<32xf32>
    %7 = vector.multi_reduction <add>, %6, %cst [1] : vector<32x32xf32> to vector<32xf32>
    %8 = vector.shape_cast %7 : vector<32xf32> to vector<32x1xf32>
    %cst_10 = arith.constant 3.200000e+01 : f32
    %9 = vector.broadcast %cst_10 : f32 to vector<32x1xf32>
    %10 = arith.divf %8, %9 : vector<32x1xf32>
    %11 = vector.broadcast %10 : vector<32x1xf32> to vector<32x32xf32>
    %12 = arith.subf %6, %11 : vector<32x32xf32>
    %13 = arith.mulf %12, %12 : vector<32x32xf32>
    %cst_11 = arith.constant dense<0.000000e+00> : vector<32xf32>
    %14 = vector.multi_reduction <add>, %13, %cst_11 [1] : vector<32x32xf32> to vector<32xf32>
    %15 = vector.shape_cast %14 : vector<32xf32> to vector<32x1xf32>
    %cst_12 = arith.constant 3.200000e+01 : f32
    %16 = vector.broadcast %cst_12 : f32 to vector<32x1xf32>
    %17 = arith.divf %15, %16 : vector<32x1xf32>
    %18 = vector.broadcast %10 : vector<32x1xf32> to vector<32x32xf32>
    %19 = arith.subf %6, %18 : vector<32x32xf32>
    %cst_13 = arith.constant 9.99999974E-6 : f32
    %20 = vector.broadcast %cst_13 : f32 to vector<32x1xf32>
    %21 = arith.addf %17, %20 : vector<32x1xf32>
    %22 = math.rsqrt %21 : vector<32x1xf32>
    %23 = vector.broadcast %22 : vector<32x1xf32> to vector<32x32xf32>
    %24 = arith.mulf %19, %23 : vector<32x32xf32>
    %c0_14 = arith.constant 0 : index
    %c0_15 = arith.constant 0 : index
    %25 = vector.load %arg5[%c0_14, %c0_15] : memref<1x32xf32, #tpu.memory_space<vmem>>, vector<1x32xf32>
    %26 = vector.broadcast %25 : vector<1x32xf32> to vector<32x32xf32>
    %27 = arith.mulf %24, %26 : vector<32x32xf32>
    %c0_16 = arith.constant 0 : index
    %c0_17 = arith.constant 0 : index
    %28 = vector.load %arg6[%c0_16, %c0_17] : memref<1x32xf32, #tpu.memory_space<vmem>>, vector<1x32xf32>
    %29 = vector.broadcast %28 : vector<1x32xf32> to vector<32x32xf32>
    %30 = arith.addf %27, %29 : vector<32x32xf32>
    %31 = arith.truncf %30 : vector<32x32xf32> to vector<32x32xbf16>
    %c0_18 = arith.constant 0 : index
    %c0_19 = arith.constant 0 : index
    %32 = vector.load %arg7[%c0_18, %c0_19] : memref<32x32xbf16, #tpu.memory_space<vmem>>, vector<32x32xbf16>
    %cst_20 = arith.constant dense<0.000000e+00> : vector<32x32xf32>
    %33 = tpu.matmul %31, %32, %cst_20 {dimension_numbers = #tpu.dot_dimension_numbers<[1], [0], [0], [1], [0, 0, 1, 1], [], []>} : vector<32x32xbf16>, vector<32x32xbf16>, vector<32x32xf32> -> vector<32x32xf32>
    %c0_21 = arith.constant 0 : index
    %c0_22 = arith.constant 0 : index
    %34 = vector.load %arg8[%c0_21, %c0_22] : memref<32x32xbf16, #tpu.memory_space<vmem>>, vector<32x32xbf16>
    %cst_23 = arith.constant dense<0.000000e+00> : vector<32x32xf32>
    %35 = tpu.matmul %31, %34, %cst_23 {dimension_numbers = #tpu.dot_dimension_numbers<[1], [0], [0], [1], [0, 0, 1, 1], [], []>} : vector<32x32xbf16>, vector<32x32xbf16>, vector<32x32xf32> -> vector<32x32xf32>
    %36 = arith.negf %35 : vector<32x32xf32>
    %37 = math.exp %36 : vector<32x32xf32>
    %cst_24 = arith.constant 1.000000e+00 : f32
    %38 = vector.broadcast %cst_24 : f32 to vector<32x32xf32>
    %39 = arith.addf %38, %37 : vector<32x32xf32>
    %40 = arith.divf %38, %39 : vector<32x32xf32>
    %41 = arith.mulf %33, %40 : vector<32x32xf32>
    %42 = tpu.iota {dimensions = array<i32: 0>} : vector<32x1xi32>
    %c16_i32 = arith.constant 16 : i32
    %43 = arith.muli %arg1, %c16_i32 : i32
    %c8_i32 = arith.constant 8 : i32
    %44 = arith.subi %43, %c8_i32 : i32
    %45 = vector.broadcast %44 : i32 to vector<32x1xi32>
    %46 = arith.addi %45, %42 : vector<32x1xi32>
    %c0_i32 = arith.constant 0 : i32
    %47 = vector.broadcast %c0_i32 : i32 to vector<32x1xi32>
    %48 = arith.cmpi sge, %46, %47 : vector<32x1xi32>
    %c16_i32_25 = arith.constant 16 : i32
    %49 = vector.broadcast %c16_i32_25 : i32 to vector<32x1xi32>
    %50 = arith.cmpi slt, %46, %49 : vector<32x1xi32>
    %51 = arith.andi %48, %50 : vector<32x1xi1>
    %cst_26 = arith.constant 0.000000e+00 : f32
    %52 = vector.shape_cast %51 : vector<32x1xi1> to vector<32x1xi1>
    %53 = vector.broadcast %52 : vector<32x1xi1> to vector<32x32xi1>
    %54 = vector.broadcast %cst_26 : f32 to vector<32x32xf32>
    %55 = arith.select %53, %41, %54 : vector<32x32xi1>, vector<32x32xf32>
    %c0_27 = arith.constant 0 : index
    %c0_28 = arith.constant 0 : index
    %56 = vector.load %arg9[%c0_27, %c0_28] : memref<5x32xf32, #tpu.memory_space<vmem>>, vector<5x32xf32>
    %c26_i32 = arith.constant 26 : i32
    %57 = tpu.dynamic_rotate %55 by %c26_i32 dim 0 : vector<32x32xf32>, i32 -> vector<32x32xf32>
    %58 = vector.extract_strided_slice %57 {offsets = [0, 0], sizes = [16, 32], strides = [1, 1]} : vector<32x32xf32> to vector<16x32xf32>
    %59 = vector.extract_strided_slice %56 {offsets = [0, 0], sizes = [1, 32], strides = [1, 1]} : vector<5x32xf32> to vector<1x32xf32>
    %60 = vector.broadcast %59 : vector<1x32xf32> to vector<16x32xf32>
    %61 = arith.mulf %58, %60 : vector<16x32xf32>
    %c25_i32 = arith.constant 25 : i32
    %62 = tpu.dynamic_rotate %55 by %c25_i32 dim 0 : vector<32x32xf32>, i32 -> vector<32x32xf32>
    %63 = vector.extract_strided_slice %62 {offsets = [0, 0], sizes = [16, 32], strides = [1, 1]} : vector<32x32xf32> to vector<16x32xf32>
    %64 = vector.extract_strided_slice %56 {offsets = [1, 0], sizes = [1, 32], strides = [1, 1]} : vector<5x32xf32> to vector<1x32xf32>
    %65 = vector.broadcast %64 : vector<1x32xf32> to vector<16x32xf32>
    %66 = arith.mulf %63, %65 : vector<16x32xf32>
    %67 = arith.addf %61, %66 : vector<16x32xf32>
    %68 = vector.extract_strided_slice %55 {offsets = [8, 0], sizes = [16, 32], strides = [1, 1]} : vector<32x32xf32> to vector<16x32xf32>
    %69 = vector.extract_strided_slice %56 {offsets = [2, 0], sizes = [1, 32], strides = [1, 1]} : vector<5x32xf32> to vector<1x32xf32>
    %70 = vector.broadcast %69 : vector<1x32xf32> to vector<16x32xf32>
    %71 = arith.mulf %68, %70 : vector<16x32xf32>
    %72 = arith.addf %67, %71 : vector<16x32xf32>
    %c31_i32 = arith.constant 31 : i32
    %73 = tpu.dynamic_rotate %55 by %c31_i32 dim 0 : vector<32x32xf32>, i32 -> vector<32x32xf32>
    %74 = vector.extract_strided_slice %73 {offsets = [8, 0], sizes = [16, 32], strides = [1, 1]} : vector<32x32xf32> to vector<16x32xf32>
    %75 = vector.extract_strided_slice %56 {offsets = [3, 0], sizes = [1, 32], strides = [1, 1]} : vector<5x32xf32> to vector<1x32xf32>
    %76 = vector.broadcast %75 : vector<1x32xf32> to vector<16x32xf32>
    %77 = arith.mulf %74, %76 : vector<16x32xf32>
    %78 = arith.addf %72, %77 : vector<16x32xf32>
    %c30_i32 = arith.constant 30 : i32
    %79 = tpu.dynamic_rotate %55 by %c30_i32 dim 0 : vector<32x32xf32>, i32 -> vector<32x32xf32>
    %80 = vector.extract_strided_slice %79 {offsets = [8, 0], sizes = [16, 32], strides = [1, 1]} : vector<32x32xf32> to vector<16x32xf32>
    %81 = vector.extract_strided_slice %56 {offsets = [4, 0], sizes = [1, 32], strides = [1, 1]} : vector<5x32xf32> to vector<1x32xf32>
    %82 = vector.broadcast %81 : vector<1x32xf32> to vector<16x32xf32>
    %83 = arith.mulf %80, %82 : vector<16x32xf32>
    %84 = arith.addf %78, %83 : vector<16x32xf32>
    %c0_29 = arith.constant 0 : index
    %c0_30 = arith.constant 0 : index
    %85 = vector.load %arg10[%c0_29, %c0_30] : memref<1x32xf32, #tpu.memory_space<vmem>>, vector<1x32xf32>
    %86 = vector.broadcast %85 : vector<1x32xf32> to vector<16x32xf32>
    %87 = arith.addf %84, %86 : vector<16x32xf32>
    %88 = arith.negf %87 : vector<16x32xf32>
    %89 = math.exp %88 : vector<16x32xf32>
    %cst_31 = arith.constant 1.000000e+00 : f32
    %90 = vector.broadcast %cst_31 : f32 to vector<16x32xf32>
    %91 = arith.addf %90, %89 : vector<16x32xf32>
    %92 = arith.divf %90, %91 : vector<16x32xf32>
    %93 = arith.mulf %87, %92 : vector<16x32xf32>
    %94 = arith.truncf %93 : vector<16x32xf32> to vector<16x32xbf16>
    %c0_32 = arith.constant 0 : index
    %c0_33 = arith.constant 0 : index
    %95 = vector.load %arg11[%c0_32, %c0_33] : memref<32x32xbf16, #tpu.memory_space<vmem>>, vector<32x32xbf16>
    %cst_34 = arith.constant dense<0.000000e+00> : vector<16x32xf32>
    %96 = tpu.matmul %94, %95, %cst_34 {dimension_numbers = #tpu.dot_dimension_numbers<[1], [0], [0], [1], [0, 0, 1, 1], [], []>} : vector<16x32xbf16>, vector<32x32xbf16>, vector<16x32xf32> -> vector<16x32xf32>
    %97 = vector.shape_cast %96 : vector<16x32xf32> to vector<1x16x32xf32>
    %c0_35 = arith.constant 0 : index
    %c0_36 = arith.constant 0 : index
    %c0_37 = arith.constant 0 : index
    %98 = vector.load %arg12[%c0_35, %c0_36, %c0_37] : memref<1x16x32xf32, #tpu.memory_space<vmem>>, vector<1x16x32xf32>
    tpu.vector_store %arg12[%c0_35, %c0_36, %c0_37], %97 {strides = array<i32>} : memref<1x16x32xf32, #tpu.memory_space<vmem>>, vector<1x16x32xf32>,
    return
  }
  func.func @transform_0(%arg0: i32, %arg1: i32) -> (i32, i32, i32) {
    %c0_i32 = arith.constant 0 : i32
    %c0_i32_0 = arith.constant 0 : i32
    return %arg0, %arg1, %c0_i32 : i32, i32, i32
  }
  func.func @transform_1(%arg0: i32, %arg1: i32) -> (i32, i32, i32, i32) {
    %c0_i32 = arith.constant 0 : i32
    %c0_i32_0 = arith.constant 0 : i32
    %c0_i32_1 = arith.constant 0 : i32
    return %arg0, %arg1, %c0_i32, %c0_i32_0 : i32, i32, i32, i32
  }
  func.func @transform_2(%arg0: i32, %arg1: i32) -> (i32, i32, i32, i32) {
    %c0_i32 = arith.constant 0 : i32
    %c0_i32_0 = arith.constant 0 : i32
    %c0_i32_1 = arith.constant 0 : i32
    return %arg0, %arg1, %c0_i32, %c0_i32_0 : i32, i32, i32, i32
  }
  func.func @transform_3(%arg0: i32, %arg1: i32) -> (i32, i32) {
    %c0_i32 = arith.constant 0 : i32
    %c0_i32_0 = arith.constant 0 : i32
    %c0_i32_1 = arith.constant 0 : i32
    return %c0_i32, %c0_i32_0 : i32, i32
  }
  func.func @transform_4(%arg0: i32, %arg1: i32) -> (i32, i32) {
    %c0_i32 = arith.constant 0 : i32
    %c0_i32_0 = arith.constant 0 : i32
    %c0_i32_1 = arith.constant 0 : i32
    return %c0_i32, %c0_i32_0 : i32, i32
  }
  func.func @transform_5(%arg0: i32, %arg1: i32) -> (i32, i32) {
    %c0_i32 = arith.constant 0 : i32
    %c0_i32_0 = arith.constant 0 : i32
    %c0_i32_1 = arith.constant 0 : i32
    return %c0_i32, %c0_i32_0 : i32, i32
  }
  func.func @transform_6(%arg0: i32, %arg1: i32) -> (i32, i32) {
    %c0_i32 = arith.constant 0 : i32
    %c0_i32_0 = arith.constant 0 : i32
    %c0_i32_1 = arith.constant 0 : i32
    return %c0_i32, %c0_i32_0 : i32, i32
  }
  func.func @transform_7(%arg0: i32, %arg1: i32) -> (i32, i32) {
    %c0_i32 = arith.constant 0 : i32
    %c0_i32_0 = arith.constant 0 : i32
    %c0_i32_1 = arith.constant 0 : i32
    return %c0_i32, %c0_i32_0 : i32, i32
  }
  func.func @transform_8(%arg0: i32, %arg1: i32) -> (i32, i32) {
    %c0_i32 = arith.constant 0 : i32
    %c0_i32_0 = arith.constant 0 : i32
    %c0_i32_1 = arith.constant 0 : i32
    return %c0_i32, %c0_i32_0 : i32, i32
  }
  func.func @transform_9(%arg0: i32, %arg1: i32) -> (i32, i32) {
    %c0_i32 = arith.constant 0 : i32
    %c0_i32_0 = arith.constant 0 : i32
    %c0_i32_1 = arith.constant 0 : i32
    return %c0_i32, %c0_i32_0 : i32, i32
  }
  func.func @transform_10(%arg0: i32, %arg1: i32) -> (i32, i32, i32) {
    %c0_i32 = arith.constant 0 : i32
    %c0_i32_0 = arith.constant 0 : i32
    return %arg0, %arg1, %c0_i32 : i32, i32, i32
  }
}

module attributes {stable_mosaic.version = 11 : i64} {
  func.func @_conformer_conv_kernel(%arg0: i32, %arg1: i32, %arg2: memref<1x16x32xf32, #tpu.memory_space<vmem>>, %arg3: memref<1x1x8x32xf32, #tpu.memory_space<vmem>>, %arg4: memref<1x1x8x32xf32, #tpu.memory_space<vmem>>, %arg5: memref<1x32xf32, #tpu.memory_space<vmem>>, %arg6: memref<1x32xf32, #tpu.memory_space<vmem>>, %arg7: memref<32x32xbf16, #tpu.memory_space<vmem>>, %arg8: memref<32x32xbf16, #tpu.memory_space<vmem>>, %arg9: memref<5x32xf32, #tpu.memory_space<vmem>>, %arg10: memref<1x32xf32, #tpu.memory_space<vmem>>, %arg11: memref<32x32xbf16, #tpu.memory_space<vmem>>, %arg12: memref<1x16x32xf32, #tpu.memory_space<vmem>>) attributes {dimension_semantics = [#tpu.dimension_semantics<parallel>, #tpu.dimension_semantics<parallel>], iteration_bounds = array<i64: 2, 1>, scalar_prefetch = 0 : i64, scratch_operands = 0 : i64, tpu.core_type = #tpu.core_type<tc>, window_params = [{transform_indices = @transform_0, window_bounds = array<i64: 1, 16, 32>}, {transform_indices = @transform_1, window_bounds = array<i64: 1, 1, 8, 32>}, {transform_indices = @transform_2, window_bounds = array<i64: 1, 1, 8, 32>}, {pipeline_mode = #tpu.pipeline_mode<synchronous>, transform_indices = @transform_3, window_bounds = array<i64: 1, 32>}, {pipeline_mode = #tpu.pipeline_mode<synchronous>, transform_indices = @transform_4, window_bounds = array<i64: 1, 32>}, {pipeline_mode = #tpu.pipeline_mode<synchronous>, transform_indices = @transform_5, window_bounds = array<i64: 32, 32>}, {pipeline_mode = #tpu.pipeline_mode<synchronous>, transform_indices = @transform_6, window_bounds = array<i64: 32, 32>}, {pipeline_mode = #tpu.pipeline_mode<synchronous>, transform_indices = @transform_7, window_bounds = array<i64: 5, 32>}, {pipeline_mode = #tpu.pipeline_mode<synchronous>, transform_indices = @transform_8, window_bounds = array<i64: 1, 32>}, {pipeline_mode = #tpu.pipeline_mode<synchronous>, transform_indices = @transform_9, window_bounds = array<i64: 32, 32>}, {transform_indices = @transform_10, window_bounds = array<i64: 1, 16, 32>}]} {
    %c0 = arith.constant 0 : index
    %c0_0 = arith.constant 0 : index
    %c0_1 = arith.constant 0 : index
    %c0_2 = arith.constant 0 : index
    %0 = vector.load %arg3[%c0, %c0_0, %c0_1, %c0_2] : memref<1x1x8x32xf32, #tpu.memory_space<vmem>>, vector<1x1x8x32xf32>
    %1 = vector.shape_cast %0 : vector<1x1x8x32xf32> to vector<8x32xf32>
    %c0_3 = arith.constant 0 : index
    %c0_4 = arith.constant 0 : index
    %c0_5 = arith.constant 0 : index
    %2 = vector.load %arg2[%c0_3, %c0_4, %c0_5] : memref<1x16x32xf32, #tpu.memory_space<vmem>>, vector<1x16x32xf32>
    %3 = vector.shape_cast %2 : vector<1x16x32xf32> to vector<16x32xf32>
    %c0_6 = arith.constant 0 : index
    %c0_7 = arith.constant 0 : index
    %c0_8 = arith.constant 0 : index
    %c0_9 = arith.constant 0 : index
    %4 = vector.load %arg4[%c0_6, %c0_7, %c0_8, %c0_9] : memref<1x1x8x32xf32, #tpu.memory_space<vmem>>, vector<1x1x8x32xf32>
    %5 = vector.shape_cast %4 : vector<1x1x8x32xf32> to vector<8x32xf32>
    %6 = tpu.concatenate %1, %3, %5 in 0 : vector<8x32xf32>, vector<16x32xf32>, vector<8x32xf32> -> vector<32x32xf32>
    %cst = arith.constant dense<0.000000e+00> : vector<32xf32>
    %7 = vector.multi_reduction <add>, %6, %cst [1] : vector<32x32xf32> to vector<32xf32>
    %8 = vector.shape_cast %7 : vector<32xf32> to vector<32x1xf32>
    %cst_10 = arith.constant 3.200000e+01 : f32
    %9 = vector.broadcast %cst_10 : f32 to vector<32x1xf32>
    %10 = arith.divf %8, %9 : vector<32x1xf32>
    %11 = vector.broadcast %10 : vector<32x1xf32> to vector<32x32xf32>
    %12 = arith.subf %6, %11 : vector<32x32xf32>
    %13 = arith.mulf %12, %12 : vector<32x32xf32>
    %cst_11 = arith.constant dense<0.000000e+00> : vector<32xf32>
    %14 = vector.multi_reduction <add>, %13, %cst_11 [1] : vector<32x32xf32> to vector<32xf32>
    %15 = vector.shape_cast %14 : vector<32xf32> to vector<32x1xf32>
    %cst_12 = arith.constant 3.200000e+01 : f32
    %16 = vector.broadcast %cst_12 : f32 to vector<32x1xf32>
    %17 = arith.divf %15, %16 : vector<32x1xf32>
    %18 = vector.broadcast %10 : vector<32x1xf32> to vector<32x32xf32>
    %19 = arith.subf %6, %18 : vector<32x32xf32>
    %cst_13 = arith.constant 9.99999974E-6 : f32
    %20 = vector.broadcast %cst_13 : f32 to vector<32x1xf32>
    %21 = arith.addf %17, %20 : vector<32x1xf32>
    %22 = math.rsqrt %21 : vector<32x1xf32>
    %23 = vector.broadcast %22 : vector<32x1xf32> to vector<32x32xf32>
    %24 = arith.mulf %19, %23 : vector<32x32xf32>
    %c0_14 = arith.constant 0 : index
    %c0_15 = arith.constant 0 : index
    %25 = vector.load %arg5[%c0_14, %c0_15] : memref<1x32xf32, #tpu.memory_space<vmem>>, vector<1x32xf32>
    %26 = vector.broadcast %25 : vector<1x32xf32> to vector<32x32xf32>
    %27 = arith.mulf %24, %26 : vector<32x32xf32>
    %c0_16 = arith.constant 0 : index
    %c0_17 = arith.constant 0 : index
    %28 = vector.load %arg6[%c0_16, %c0_17] : memref<1x32xf32, #tpu.memory_space<vmem>>, vector<1x32xf32>
    %29 = vector.broadcast %28 : vector<1x32xf32> to vector<32x32xf32>
    %30 = arith.addf %27, %29 : vector<32x32xf32>
    %31 = arith.truncf %30 : vector<32x32xf32> to vector<32x32xbf16>
    %c0_18 = arith.constant 0 : index
    %c0_19 = arith.constant 0 : index
    %32 = vector.load %arg7[%c0_18, %c0_19] : memref<32x32xbf16, #tpu.memory_space<vmem>>, vector<32x32xbf16>
    %cst_20 = arith.constant dense<0.000000e+00> : vector<32x32xf32>
    %33 = tpu.matmul %31, %32, %cst_20 {dimension_numbers = #tpu.dot_dimension_numbers<[1], [0], [0], [1], [0, 0, 1, 1], [], []>} : vector<32x32xbf16>, vector<32x32xbf16>, vector<32x32xf32> -> vector<32x32xf32>
    %c0_21 = arith.constant 0 : index
    %c0_22 = arith.constant 0 : index
    %34 = vector.load %arg8[%c0_21, %c0_22] : memref<32x32xbf16, #tpu.memory_space<vmem>>, vector<32x32xbf16>
    %cst_23 = arith.constant dense<0.000000e+00> : vector<32x32xf32>
    %35 = tpu.matmul %31, %34, %cst_23 {dimension_numbers = #tpu.dot_dimension_numbers<[1], [0], [0], [1], [0, 0, 1, 1], [], []>} : vector<32x32xbf16>, vector<32x32xbf16>, vector<32x32xf32> -> vector<32x32xf32>
    %36 = arith.negf %35 : vector<32x32xf32>
    %37 = math.exp %36 : vector<32x32xf32>
    %cst_24 = arith.constant 1.000000e+00 : f32
    %38 = vector.broadcast %cst_24 : f32 to vector<32x32xf32>
    %39 = arith.addf %38, %37 : vector<32x32xf32>
    %40 = arith.divf %38, %39 : vector<32x32xf32>
    %41 = arith.mulf %33, %40 : vector<32x32xf32>
    %42 = tpu.iota {dimensions = array<i32: 0>} : vector<32x1xi32>
    %c16_i32 = arith.constant 16 : i32
    %43 = arith.muli %arg1, %c16_i32 : i32
    %c8_i32 = arith.constant 8 : i32
    %44 = arith.subi %43, %c8_i32 : i32
    %45 = vector.broadcast %44 : i32 to vector<32x1xi32>
    %46 = arith.addi %45, %42 : vector<32x1xi32>
    %c0_i32 = arith.constant 0 : i32
    %47 = vector.broadcast %c0_i32 : i32 to vector<32x1xi32>
    %48 = arith.cmpi sge, %46, %47 : vector<32x1xi32>
    %c16_i32_25 = arith.constant 16 : i32
    %49 = vector.broadcast %c16_i32_25 : i32 to vector<32x1xi32>
    %50 = arith.cmpi slt, %46, %49 : vector<32x1xi32>
    %51 = arith.andi %48, %50 : vector<32x1xi1>
    %cst_26 = arith.constant 0.000000e+00 : f32
    %52 = vector.shape_cast %51 : vector<32x1xi1> to vector<32x1xi1>
    %53 = vector.broadcast %52 : vector<32x1xi1> to vector<32x32xi1>
    %54 = vector.broadcast %cst_26 : f32 to vector<32x32xf32>
    %55 = arith.select %53, %41, %54 : vector<32x32xi1>, vector<32x32xf32>
    %c0_27 = arith.constant 0 : index
    %c0_28 = arith.constant 0 : index
    %56 = vector.load %arg9[%c0_27, %c0_28] : memref<5x32xf32, #tpu.memory_space<vmem>>, vector<5x32xf32>
    %c26_i32 = arith.constant 26 : i32
    %57 = tpu.dynamic_rotate %55 by %c26_i32 dim 0 : vector<32x32xf32>, i32 -> vector<32x32xf32>
    %58 = vector.extract_strided_slice %57 {offsets = [0, 0], sizes = [16, 32], strides = [1, 1]} : vector<32x32xf32> to vector<16x32xf32>
    %59 = vector.extract_strided_slice %56 {offsets = [0, 0], sizes = [1, 32], strides = [1, 1]} : vector<5x32xf32> to vector<1x32xf32>
    %60 = vector.broadcast %59 : vector<1x32xf32> to vector<16x32xf32>
    %61 = arith.mulf %58, %60 : vector<16x32xf32>
    %c25_i32 = arith.constant 25 : i32
    %62 = tpu.dynamic_rotate %55 by %c25_i32 dim 0 : vector<32x32xf32>, i32 -> vector<32x32xf32>
    %63 = vector.extract_strided_slice %62 {offsets = [0, 0], sizes = [16, 32], strides = [1, 1]} : vector<32x32xf32> to vector<16x32xf32>
    %64 = vector.extract_strided_slice %56 {offsets = [1, 0], sizes = [1, 32], strides = [1, 1]} : vector<5x32xf32> to vector<1x32xf32>
    %65 = vector.broadcast %64 : vector<1x32xf32> to vector<16x32xf32>
    %66 = arith.mulf %63, %65 : vector<16x32xf32>
    %67 = arith.addf %61, %66 : vector<16x32xf32>
    %68 = vector.extract_strided_slice %55 {offsets = [8, 0], sizes = [16, 32], strides = [1, 1]} : vector<32x32xf32> to vector<16x32xf32>
    %69 = vector.extract_strided_slice %56 {offsets = [2, 0], sizes = [1, 32], strides = [1, 1]} : vector<5x32xf32> to vector<1x32xf32>
    %70 = vector.broadcast %69 : vector<1x32xf32> to vector<16x32xf32>
    %71 = arith.mulf %68, %70 : vector<16x32xf32>
    %72 = arith.addf %67, %71 : vector<16x32xf32>
    %c31_i32 = arith.constant 31 : i32
    %73 = tpu.dynamic_rotate %55 by %c31_i32 dim 0 : vector<32x32xf32>, i32 -> vector<32x32xf32>
    %74 = vector.extract_strided_slice %73 {offsets = [8, 0], sizes = [16, 32], strides = [1, 1]} : vector<32x32xf32> to vector<16x32xf32>
    %75 = vector.extract_strided_slice %56 {offsets = [3, 0], sizes = [1, 32], strides = [1, 1]} : vector<5x32xf32> to vector<1x32xf32>
    %76 = vector.broadcast %75 : vector<1x32xf32> to vector<16x32xf32>
    %77 = arith.mulf %74, %76 : vector<16x32xf32>
    %78 = arith.addf %72, %77 : vector<16x32xf32>
    %c30_i32 = arith.constant 30 : i32
    %79 = tpu.dynamic_rotate %55 by %c30_i32 dim 0 : vector<32x32xf32>, i32 -> vector<32x32xf32>
    %80 = vector.extract_strided_slice %79 {offsets = [8, 0], sizes = [16, 32], strides = [1, 1]} : vector<32x32xf32> to vector<16x32xf32>
    %81 = vector.extract_strided_slice %56 {offsets = [4, 0], sizes = [1, 32], strides = [1, 1]} : vector<5x32xf32> to vector<1x32xf32>
    %82 = vector.broadcast %81 : vector<1x32xf32> to vector<16x32xf32>
    %83 = arith.mulf %80, %82 : vector<16x32xf32>
    %84 = arith.addf %78, %83 : vector<16x32xf32>
    %c0_29 = arith.constant 0 : index
    %c0_30 = arith.constant 0 : index
    %85 = vector.load %arg10[%c0_29, %c0_30] : memref<1x32xf32, #tpu.memory_space<vmem>>, vector<1x32xf32>
    %86 = vector.broadcast %85 : vector<1x32xf32> to vector<16x32xf32>
    %87 = arith.addf %84, %86 : vector<16x32xf32>
    %88 = arith.negf %87 : vector<16x32xf32>
    %89 = math.exp %88 : vector<16x32xf32>
    %cst_31 = arith.constant 1.000000e+00 : f32
    %90 = vector.broadcast %cst_31 : f32 to vector<16x32xf32>
    %91 = arith.addf %90, %89 : vector<16x32xf32>
    %92 = arith.divf %90, %91 : vector<16x32xf32>
    %93 = arith.mulf %87, %92 : vector<16x32xf32>
    %94 = arith.truncf %93 : vector<16x32xf32> to vector<16x32xbf16>
    %c0_32 = arith.constant 0 : index
    %c0_33 = arith.constant 0 : index
    %95 = vector.load %arg11[%c0_32, %c0_33] : memref<32x32xbf16, #tpu.memory_space<vmem>>, vector<32x32xbf16>
    %cst_34 = arith.constant dense<0.000000e+00> : vector<16x32xf32>
    %96 = tpu.matmul %94, %95, %cst_34 {dimension_numbers = #tpu.dot_dimension_numbers<[1], [0], [0], [1], [0, 0, 1, 1], [], []>} : vector<16x32xbf16>, vector<32x32xbf16>, vector<16x32xf32> -> vector<16x32xf32>
    %97 = vector.shape_cast %96 : vector<16x32xf32> to vector<1x16x32xf32>
    %c0_35 = arith.constant 0 : index
    %c0_36 = arith.constant 0 : index
    %c0_37 = arith.constant 0 : index
    %98 = vector.load %arg12[%c0_35, %c0_36, %c0_37] : memref<1x16x32xf32, #tpu.memory_space<vmem>>, vector<1x16x32xf32>
    tpu.vector_store %arg12[%c0_35, %c0_36, %c0_37], %97 {strides = array<i32>} : memref<1x16x32xf32, #tpu.memory_space<vmem>>, vector<1x16x32xf32>,
    return
  }
  func.func @transform_0(%arg0: i32, %arg1: i32) -> (i32, i32, i32) {
    %c0_i32 = arith.constant 0 : i32
    %c0_i32_0 = arith.constant 0 : i32
    return %arg0, %arg1, %c0_i32 : i32, i32, i32
  }
  func.func @transform_1(%arg0: i32, %arg1: i32) -> (i32, i32, i32, i32) {
    %c0_i32 = arith.constant 0 : i32
    %c0_i32_0 = arith.constant 0 : i32
    %c0_i32_1 = arith.constant 0 : i32
    return %arg0, %arg1, %c0_i32, %c0_i32_0 : i32, i32, i32, i32
  }
  func.func @transform_2(%arg0: i32, %arg1: i32) -> (i32, i32, i32, i32) {
    %c0_i32 = arith.constant 0 : i32
    %c0_i32_0 = arith.constant 0 : i32
    %c0_i32_1 = arith.constant 0 : i32
    return %arg0, %arg1, %c0_i32, %c0_i32_0 : i32, i32, i32, i32
  }
  func.func @transform_3(%arg0: i32, %arg1: i32) -> (i32, i32) {
    %c0_i32 = arith.constant 0 : i32
    %c0_i32_0 = arith.constant 0 : i32
    %c0_i32_1 = arith.constant 0 : i32
    return %c0_i32, %c0_i32_0 : i32, i32
  }
  func.func @transform_4(%arg0: i32, %arg1: i32) -> (i32, i32) {
    %c0_i32 = arith.constant 0 : i32
    %c0_i32_0 = arith.constant 0 : i32
    %c0_i32_1 = arith.constant 0 : i32
    return %c0_i32, %c0_i32_0 : i32, i32
  }
  func.func @transform_5(%arg0: i32, %arg1: i32) -> (i32, i32) {
    %c0_i32 = arith.constant 0 : i32
    %c0_i32_0 = arith.constant 0 : i32
    %c0_i32_1 = arith.constant 0 : i32
    return %c0_i32, %c0_i32_0 : i32, i32
  }
  func.func @transform_6(%arg0: i32, %arg1: i32) -> (i32, i32) {
    %c0_i32 = arith.constant 0 : i32
    %c0_i32_0 = arith.constant 0 : i32
    %c0_i32_1 = arith.constant 0 : i32
    return %c0_i32, %c0_i32_0 : i32, i32
  }
  func.func @transform_7(%arg0: i32, %arg1: i32) -> (i32, i32) {
    %c0_i32 = arith.constant 0 : i32
    %c0_i32_0 = arith.constant 0 : i32
    %c0_i32_1 = arith.constant 0 : i32
    return %c0_i32, %c0_i32_0 : i32, i32
  }
  func.func @transform_8(%arg0: i32, %arg1: i32) -> (i32, i32) {
    %c0_i32 = arith.constant 0 : i32
    %c0_i32_0 = arith.constant 0 : i32
    %c0_i32_1 = arith.constant 0 : i32
    return %c0_i32, %c0_i32_0 : i32, i32
  }
  func.func @transform_9(%arg0: i32, %arg1: i32) -> (i32, i32) {
    %c0_i32 = arith.constant 0 : i32
    %c0_i32_0 = arith.constant 0 : i32
    %c0_i32_1 = arith.constant 0 : i32
    return %c0_i32, %c0_i32_0 : i32, i32
  }
  func.func @transform_10(%arg0: i32, %arg1: i32) -> (i32, i32, i32) {
    %c0_i32 = arith.constant 0 : i32
    %c0_i32_0 = arith.constant 0 : i32
    return %arg0, %arg1, %c0_i32 : i32, i32, i32
  }
}

</mosaic_0001>

<bundles_post_ra>
// kernel: tpu_custom_call.1
= control target key start
LH: loop header
LB: loop body
LE: loop exit
PB: predicated region body
PF: predicated region fallthrough
CT: control target
= control target key end

     0   :  { %s2429_s0 = inlined_call_operand.hbm [shape: f32[2,16,32], index: 0, kind: input, shape index: {}]   ;;  %s2430_s1 = inlined_call_operand.hbm [shape: f32[2,1,8,32], index: 1, kind: input, shape index: {}]   ;;  %s2431_s2 = inlined_call_operand.hbm [shape: f32[2,1,8,32], index: 2, kind: input, shape index: {}]   ;;  %s2432_s3 = inlined_call_operand.hbm [shape: f32[1,32], index: 3, kind: input, shape index: {}]   ;;  %s2433_s4 = inlined_call_operand.hbm [shape: f32[1,32], index: 4, kind: input, shape index: {}]   ;;  %s2434_s5 = inlined_call_operand.hbm [shape: bf16[32,32], index: 5, kind: input, shape index: {}]   ;;  %s2435_s6 = inlined_call_operand.hbm [shape: bf16[32,32], index: 6, kind: input, shape index: {}]   ;;  %s2436_s7 = inlined_call_operand.hbm [shape: f32[5,32], index: 7, kind: input, shape index: {}]   ;;  %s2437_s8 = inlined_call_operand.hbm [shape: f32[1,32], index: 8, kind: input, shape index: {}]   ;;  %s2438_s9 = inlined_call_operand.hbm [shape: bf16[32,32], index: 9, kind: input, shape index: {}]   ;;  %s2439_s10 = inlined_call_operand.hbm [shape: f32[2,16,32], index: 10, kind: output, shape index: {}]  }
   0x1   :  { %2469 = sst [smem:[#allocation36_spill]] %s2430_s1 }
   0x2   :  { %2470 = sst [smem:[#allocation37_spill]] %s2432_s3 }
   0x3   :  { %2471 = sst [smem:[#allocation38_spill]] %s2434_s5 }
   0x4   :  { %2472 = sst [smem:[#allocation39_spill]] %s2436_s7 }
   0x5   :  { %2473 = sst [smem:[#allocation40_spill]] %s2439_s10 }
   0x6   :  { %15 = vsyncpa [#allocation3], 0 }
   0x7   :  { %17 = vsyncpa [#allocation3 + $0x1], 0 }
   0x8   :  { %18 = vsyncpa [#allocation6], 0 }
   0x9   :  { %20 = vsyncpa [#allocation6 + $0x1], 0 }
   0xa   :  { %21 = vsyncpa [#allocation9], 0 }
   0xb   :  { %22 = vsyncpa [#allocation12], 0 }
   0xc   :  { %23 = vsyncpa [#allocation15], 0 }
   0xd   :  { %24 = vsyncpa [#allocation18], 0 }
   0xe   :  { %25 = vsyncpa [#allocation4], 0 }
   0xf   :  { %27 = vsyncpa [#allocation4 + $0x1], 0  ;;  %s1953_s13 = smov 0   ;;  %s1955_s14 = smov 0  }
  0x10   :  { %s1957_s15 = smov 0   ;;  %s1959_s16 = smov 0  }
  0x11   :  { %s1961_s17 = smov 0   ;;  %s1963_s18 = smov 0  }
  0x12 LB: > { %2474 = sst [smem:[#allocation27_spill]] %s1857_s13  ;;  %s1984_s19 = sadd.s32 4294967295, %s1877_s18   ;;  %s1877_s18 = sphi %s1963_s18, %s33_s18   ;;  %s1873_s17 = sphi %s1961_s17, %s2531_s17   ;;  %s1869_s16 = sphi %s1959_s16, %s2530_s16   ;;  %s1865_s15 = sphi %s1957_s15, %s2526_s15   ;;  %s1861_s14 = sphi %s1955_s14, %s2529_s14   ;;  %s1857_s13 = sphi %s1953_s13, %s2528_s13  }
  0x13   : > { %2475 = sst [smem:[#allocation28_spill]] %s1865_s15  ;;  %p1218_p0 = scmp.ge.s32.totalorder %s1877_s18, 1 }
  0x14   : > { %2476 = sst [smem:[#allocation29_spill]] %s1869_s16  ;;  %p2440_p1 = scmp.eq.s32.totalorder %s1984_s19, 0 }
  0x15   : > { %2477 = sst [smem:[#allocation30_spill]] %s1877_s18  ;;  %p309_p2 = scmp.lt.s32.totalorder %s1877_s18, 3 }
  0x16   : > { %2478 = sst [smem:[#allocation31_spill]] %s1984_s19  ;;  %s1879_s21 = smov [#allocation8]  }
  0x17   : > { %p1989_p3 = pnand %p1218_p0, %p309_p2  ;;  %s322_s22 = sshll.u32 %s1879_s21, 4  ;;  %s323_s22 = int_to_ptr.vmem [resolvable:$true] %s322_s22 }
  0x18   : > { %s1880_s23 = smov [#allocation11]   ;;  %s1881_s26 = smov [#allocation14]  }
  0x19   : > { %s2479_s20 = scalar_select %p1989_p3, 1, 0 }
  0x1a   : > { %p1344_p5 = pneg %p1989_p3  ;;  %s343_s24 = sshll.u32 %s1880_s23, 4  ;;  %s2002_s24 = int_to_ptr.vmem [resolvable:$true] %s343_s24 }
  0x1b   : > { %s2004_s27 = sshll.u32 %s1881_s26, 4  ;;  %s2481_s3 = sld [smem:[#allocation37_spill]]  ;;  %s371_s27 = int_to_ptr.vmem [resolvable:$true] %s2004_s27 }
  0x1c   : > { %p1998_p6 = pnand %p1344_p5, %p2440_p1 }
  0x1e   : > { %s2480_s25 = scalar_select %p1998_p6, 1, 0 }
  0x1f   : > { %p2014_p8 = pneg %p1998_p6 }
  0x21   : > { %s1489_s30 = scalar_lea.hbm %s2481_s3, 16 }
  0x22   : > { %p1490_p7 = scmp.ne.s32.totalorder %s2481_s3, %s1489_s30  ;;  %p1496_p11 = scmp.lt.u32.totalorder %s1489_s30, %s2481_s3 }
  0x23   : > { %s2482_s21 = scalar_select %p2014_p8, 1, 0 }
  0x24   : > { %p1492_p9 = pnand %p2014_p8, %p1490_p7 }
  0x26   : > { %p1493_p10 = pneg %p1492_p9 }
  0x28   : > { %p1498_p12 = pnand %p1496_p11, %p1493_p10 }
  0x2a   : > { %1501 = shalt.err (!%p1498_p12)
}
  0x2b   : > { %s1502_s28 = scalar_lea.vmem %s323_s22, 16  ;;  %s1509_s29 = scalar_lea.vmem %s323_s22, 32 }
  0x2c   : > { %p1503_p13 = scmp.ne.s32.totalorder %s323_s22, %s1502_s28  ;;  %p1510_p5 = scmp.lt.s32.totalorder %s323_s22, %s323_s22 }
  0x2d   : > { %p1511_p4 = scmp.lt.s32.totalorder %s1509_s29, %s1502_s28 }
  0x2e   : > { %p1505_p0 = pnand %p1503_p13, %p2014_p8 }
  0x2f   : > { %p1512_p1 = por %p1511_p4, %p1510_p5 }
  0x30   : > { %p1506_p2 = pneg %p1505_p0 }
  0x32   : > { %p1513_p3 = pnand %p1512_p1, %p1506_p2 }
  0x34   : > { %1516 = shalt.err (!%p1513_p3)
}
  0x35   : > { %1347 = dma.hbm_to_vmem [thread:$0]  (!%p1998_p6), %s2481_s3, 16, %s323_s22, [#allocation9]  }
  0x36   : > { %s2483_s5 = sld [smem:[#allocation38_spill]] }
  0x3c   : > { %s1517_s26 = scalar_lea.hbm %s2483_s5, 256 }
  0x3d   : > { %p1518_p7 = scmp.ne.s32.totalorder %s2483_s5, %s1517_s26  ;;  %p1524_p1 = scmp.lt.u32.totalorder %s1517_s26, %s2483_s5 }
  0x3f   : > { %p1520_p9 = pnand %p1518_p7, %p2014_p8 }
  0x41   : > { %p1521_p4 = pneg %p1520_p9 }
  0x43   : > { %p1526_p3 = pnand %p1524_p1, %p1521_p4 }
  0x45   : > { %1529 = shalt.err (!%p1526_p3)
}
  0x46   : > { %s1530_s22 = scalar_lea.vmem %s2002_s24, 256  ;;  %p1538_p13 = scmp.lt.s32.totalorder %s2002_s24, %s2002_s24 }
  0x47   : > { %p1531_p10 = scmp.ne.s32.totalorder %s2002_s24, %s1530_s22  ;;  %p1539_p0 = scmp.lt.s32.totalorder %s1530_s22, %s1530_s22 }
  0x49   : > { %p1533_p11 = pnand %p1531_p10, %p2014_p8  ;;  %p1540_p2 = por %p1539_p0, %p1538_p13 }
  0x4b   : > { %p1534_p12 = pneg %p1533_p11 }
  0x4d   : > { %p1541_p5 = pnand %p1540_p2, %p1534_p12 }
  0x4f   : > { %1544 = shalt.err (!%p1541_p5)
}
  0x50   : > { %s2443_s10 = smov 64   ;;  %s2445_s16 = smov 4  }
  0x51   : > { %1353 = dma.hbm_to_vmem [thread:$0]  (!%p1998_p6), %s2483_s5, 256, %s2002_s24, [#allocation12], %s2443_s10, %s2443_s10, %s2445_s16  }
  0x52   : > { %s2484_s7 = sld [smem:[#allocation39_spill]] }
  0x58   : > { %s1545_s26 = scalar_lea.hbm %s2484_s7, 128 }
  0x59   : > { %p1546_p7 = scmp.ne.s32.totalorder %s2484_s7, %s1545_s26  ;;  %p1552_p1 = scmp.lt.u32.totalorder %s1545_s26, %s2484_s7 }
  0x5b   : > { %p1548_p9 = pnand %p1546_p7, %p2014_p8 }
  0x5d   : > { %p1549_p4 = pneg %p1548_p9 }
  0x5f   : > { %p1554_p3 = pnand %p1552_p1, %p1549_p4 }
  0x61   : > { %1557 = shalt.err (!%p1554_p3)
}
  0x62   : > { %s1558_s11 = scalar_lea.vmem %s371_s27, 128  ;;  %p1566_p13 = scmp.lt.s32.totalorder %s371_s27, %s371_s27 }
  0x63   : > { %p1559_p10 = scmp.ne.s32.totalorder %s371_s27, %s1558_s11  ;;  %p1567_p0 = scmp.lt.s32.totalorder %s1558_s11, %s1558_s11 }
  0x65   : > { %p1561_p11 = pnand %p1559_p10, %p2014_p8  ;;  %p1568_p2 = por %p1567_p0, %p1566_p13 }
  0x67   : > { %p1562_p12 = pneg %p1561_p11 }
  0x69   : > { %p1569_p5 = pnand %p1568_p2, %p1562_p12 }
  0x6b   : > { %1572 = shalt.err (!%p1569_p5)
}
  0x6c   : > { %1359 = dma.hbm_to_vmem [thread:$0]  (!%p1998_p6), %s2484_s7, 128, %s371_s27, [#allocation15]  }
  0x6d   : > { %s1217_s3 = sadd.s32 4294967294, %s1877_s18   ;;  %s45_s30 = sadd.s32 1, %s1873_s17 }
  0x6e   : > { %s54_s23 = sadd.s32 1, %s1865_s15  ;;  %p47_p7 = scmp.ge.s32.totalorder %s45_s30, 2 }
  0x6f   : > { %p61_p9 = scmp.ne.s32.totalorder %s1865_s15, %s1861_s14  ;;  %p62_p4 = scmp.eq.s32.totalorder %s1877_s18, 0 }
  0x70   : > { %p67_p1 = scmp.ne.s32.totalorder %s1861_s14, %s1857_s13  ;;  %s2533_s30 = smov (%p47_p7, %s45_s30), 0 }
  0x71   : > { %2485 = sst [smem:[#allocation32_spill]] %s2533_s30  ;;  %p63_p3 = por %p62_p4, %p61_p9 }
  0x72   : > { %p2486_p10 = scmp.eq.s32.totalorder %s1984_s19, 0  ;;  %s49_s27 = ssub.s32 %s1873_s17, %s2533_s30 }
  0x73   : > { %p296_p12 = scmp.eq.s32.totalorder %s1984_s19, 1  ;;  %p52_p13 = scmp.eq.s32.totalorder %s49_s27, 0 }
  0x74   : > { %p2087_p11 = por %p2486_p10, %p67_p1  ;;  %p302_p0 = scmp.eq.s32.totalorder %s1217_s3, 1 }
  0x75   : > { %p2094_p2 = por %p296_p12, %p61_p9  ;;  %p1387_p5 = scmp.lt.s32.totalorder %s1877_s18, 2 }
  0x76   : > { %s2487_s26 = scalar_select %p2087_p11, 1, 0 }
  0x77   : > { %s2488_s28 = scalar_select %p2094_p2, 1, 0 }
  0x78   : > { %s2100_s29 = scalar_select %p52_p13, %s1865_s15, %s54_s23  }
  0x79   : > { %2489 = sst [smem:[#allocation33_spill]] %s2488_s28  ;;  %p2102_p7 = por %p302_p0, %p67_p1 }
  0x7a   : > { %2490 = sst [smem:[#allocation34_spill]] %s2100_s29  ;;  %s2107_s11 = sand.u32 1, %s1865_s15  }
  0x7b   : > { %s2491_s22 = scalar_select %p2102_p7, 1, 0 }
  0x7c   : > { %p2109_p4 = pnand %p1387_p5, %p63_p3  ;;  %s428_s12 = sand.u32 1, %s1877_s18  }
  0x7d   : > { %2492 = sst [smem:[#allocation35_spill]] %s2491_s22  ;;  %s2448_s3 = sshll.u32 %s2107_s11, 3 }
  0x7e   : > { %s2493_s24 = scalar_select %p2109_p4, 1, 0 }
  0x7f   : > { %s2449_s27 = sshll.u32 %s1873_s17, 7  ;;  %s432_s10 = scalar_lea.vmem [#allocation5], %s2448_s3 }
  0x80   : > { %s440_s23 = sshll.u32 %s432_s10, 4  ;;  %s2494_s1 = sld [smem:[#allocation36_spill]]  ;;  %s2125_s23 = int_to_ptr.vmem [resolvable:$true] %s440_s23 }
  0x81   : > { %s2127_s30 = scalar_lea.sflag [#allocation6], %s428_s12  ;;  %p2133_p1 = pneg %p2109_p4 }
  0x83   : > { %s2495_s3 = scalar_select %p2133_p1, 1, 0 }
  0x86   : > { %s2123_s7 = scalar_lea.hbm %s2494_s1, %s2449_s27  ;;  %s1578_s16 = scalar_lea.hbm %s2494_s1, 256 }
  0x87   : > { %s1573_s29 = scalar_lea.hbm %s2123_s7, 128  ;;  %p1579_p12 = scmp.lt.u32.totalorder %s2123_s7, %s2494_s1 }
  0x88   : > { %p1574_p9 = scmp.ne.s32.totalorder %s2123_s7, %s1573_s29  ;;  %p1580_p13 = scmp.lt.u32.totalorder %s1578_s16, %s1573_s29 }
  0x89   : > { %p1582_p5 = scmp.lt.u32.totalorder %s1573_s29, %s2123_s7 }
  0x8a   : > { %p1576_p3 = pnand %p2133_p1, %p1574_p9  ;;  %p1581_p0 = por %p1580_p13, %p1579_p12 }
  0x8c   : > { %p1577_p10 = pneg %p1576_p3  ;;  %p1583_p7 = por %p1582_p5, %p1581_p0 }
  0x8e   : > { %p1584_p2 = pnand %p1583_p7, %p1577_p10 }
  0x90   : > { %1587 = shalt.err (!%p1584_p2)
}
  0x91   : > { %s1588_s12 = scalar_lea.vmem %s2125_s23, 128  ;;  %s1884_s5 = smov [#allocation5]  }
  0x92   : > { %p1589_p9 = scmp.ne.s32.totalorder %s2125_s23, %s1588_s12  ;;  %s1593_s10 = sshll.u32 %s1884_s5, 4  ;;  %s1594_s10 = int_to_ptr.vmem [resolvable:$false] %s1593_s10 }
  0x93   : > { %s1595_s15 = scalar_lea.vmem %s1594_s10, 256  ;;  %p1596_p6 = scmp.lt.s32.totalorder %s2125_s23, %s1594_s10 }
  0x94   : > { %p1591_p3 = pnand %p1589_p9, %p2133_p1  ;;  %p1597_p8 = scmp.lt.s32.totalorder %s1595_s15, %s1588_s12 }
  0x96   : > { %p1592_p11 = pneg %p1591_p3  ;;  %p1598_p12 = por %p1597_p8, %p1596_p6 }
  0x98   : > { %p1599_p13 = pnand %p1598_p12, %p1592_p11 }
  0x9a   : > { %1602 = shalt.err (!%p1599_p13)
}
  0x9b   : > { %1372 = dma.hbm_to_vmem [thread:$0]  (!%p2109_p4), %s2123_s7, 128, %s2125_s23, %s2127_s30  }
  0x9c   : > { %s2496_s29 = sshll.u32 %s1873_s17, 7  ;;  %s1885_s1 = smov [#allocation10]  }
  0x9d   : > { %s2162_s5 = scalar_lea.hbm %s2431_s2, %s2496_s29  ;;  %s333_s10 = sshll.u32 %s1885_s1, 4  ;;  %s334_s10 = int_to_ptr.vmem [resolvable:$true] %s333_s10 }
  0x9e   : > { %s1886_s12 = smov [#allocation13]   ;;  %s1603_s13 = scalar_lea.hbm %s2433_s4, 16 }
  0x9f   : > { %s356_s15 = sshll.u32 %s1886_s12, 4  ;;  %p1604_p6 = scmp.ne.s32.totalorder %s2433_s4, %s1603_s13  ;;  %s2164_s15 = int_to_ptr.vmem [resolvable:$true] %s356_s15 }
  0xa0   : > { %p2497_p8 = scmp.ne.s32.totalorder %s2482_s21, 0  ;;  %p1610_p7 = scmp.lt.u32.totalorder %s1603_s13, %s2433_s4 }
  0xa2   : > { %p1606_p11 = pnand %p1604_p6, %p2497_p8 }
  0xa4   : > { %p1607_p2 = pneg %p1606_p11 }
  0xa6   : > { %p1612_p10 = pnand %p1610_p7, %p1607_p2 }
  0xa8   : > { %1615 = shalt.err (!%p1612_p10)
}
  0xa9   : > { %s1616_s1 = scalar_lea.vmem %s334_s10, 16  ;;  %s1623_s18 = scalar_lea.vmem %s334_s10, 32 }
  0xaa   : > { %p1617_p0 = scmp.ne.s32.totalorder %s334_s10, %s1616_s1  ;;  %p1624_p3 = scmp.lt.s32.totalorder %s334_s10, %s334_s10 }
  0xab   : > { %p1625_p12 = scmp.lt.s32.totalorder %s1623_s18, %s1616_s1 }
  0xac   : > { %p1619_p5 = pnand %p1617_p0, %p2497_p8 }
  0xad   : > { %p1626_p13 = por %p1625_p12, %p1624_p3 }
  0xae   : > { %p1620_p9 = pneg %p1619_p5 }
  0xb0   : > { %p1627_p4 = pnand %p1626_p13, %p1620_p9 }
  0xb2   : > { %1630 = shalt.err (!%p1627_p4)
}
  0xb3   : > { %p2498_p6 = scmp.ne.s32.totalorder %s2480_s25, 0  ;;  %s1631_s29 = scalar_lea.hbm %s2435_s6, 256 }
  0xb4   : > { %p1632_p11 = scmp.ne.s32.totalorder %s2435_s6, %s1631_s29  ;;  %p1638_p4 = scmp.lt.u32.totalorder %s1631_s29, %s2435_s6 }
  0xb5   : > { %1350 = dma.hbm_to_vmem [thread:$0]  (!%p2498_p6), %s2433_s4, 16, %s334_s10, [#allocation9]  }
  0xb6   : > { %p1634_p2 = pnand %p1632_p11, %p2497_p8 }
  0xb8   : > { %p1635_p7 = pneg %p1634_p2 }
  0xba   : > { %p1640_p10 = pnand %p1638_p4, %p1635_p7 }
  0xbc   : > { %1643 = shalt.err (!%p1640_p10)
}
  0xbd   : > { %s1644_s10 = scalar_lea.vmem %s2164_s15, 256  ;;  %p1652_p3 = scmp.lt.s32.totalorder %s2164_s15, %s2164_s15 }
  0xbe   : > { %p1645_p0 = scmp.ne.s32.totalorder %s2164_s15, %s1644_s10  ;;  %p1653_p12 = scmp.lt.s32.totalorder %s1644_s10, %s1644_s10 }
  0xc0   : > { %p1647_p5 = pnand %p1645_p0, %p2497_p8  ;;  %p1654_p13 = por %p1653_p12, %p1652_p3 }
  0xc2   : > { %p1648_p9 = pneg %p1647_p5 }
  0xc4   : > { %p1655_p11 = pnand %p1654_p13, %p1648_p9 }
  0xc6   : > { %1658 = shalt.err (!%p1655_p11)
}
  0xc7   : > { %s2499_s23 = smov 4   ;;  %s2500_s1 = smov 64  }
  0xc8   : > { %1356 = dma.hbm_to_vmem [thread:$0]  (!%p2498_p6), %s2435_s6, 256, %s2164_s15, [#allocation12], %s2500_s1, %s2500_s1, %s2499_s23  }
  0xc9   : > { %s1887_s28 = smov [#allocation16]   ;;  %s1888_s22 = smov [#allocation17]  }
  0xca   : > { %s381_s13 = sshll.u32 %s1887_s28, 4  ;;  %s391_s29 = sshll.u32 %s1888_s22, 4  ;;  %s382_s13 = int_to_ptr.vmem [resolvable:$true] %s381_s13  ;;  %s2210_s29 = int_to_ptr.vmem [resolvable:$true] %s391_s29 }
  0xcb   : > { %s1659_s12 = scalar_lea.hbm %s2437_s8, 16 }
  0xcc   : > { %p1660_p2 = scmp.ne.s32.totalorder %s2437_s8, %s1659_s12  ;;  %p1666_p10 = scmp.lt.u32.totalorder %s1659_s12, %s2437_s8 }
  0xce   : > { %p1662_p7 = pnand %p1660_p2, %p2497_p8 }
  0xd0   : > { %p1663_p4 = pneg %p1662_p7 }
  0xd2   : > { %p1668_p0 = pnand %p1666_p10, %p1663_p4 }
  0xd4   : > { %1671 = shalt.err (!%p1668_p0)
}
  0xd5   : > { %s1672_s19 = scalar_lea.vmem %s382_s13, 16  ;;  %s1679_s28 = scalar_lea.vmem %s382_s13, 32 }
  0xd6   : > { %p1673_p5 = scmp.ne.s32.totalorder %s382_s13, %s1672_s19  ;;  %p1680_p12 = scmp.lt.s32.totalorder %s382_s13, %s382_s13 }
  0xd7   : > { %p1681_p13 = scmp.lt.s32.totalorder %s1679_s28, %s1672_s19 }
  0xd8   : > { %p1675_p9 = pnand %p1673_p5, %p2497_p8 }
  0xd9   : > { %p1682_p11 = por %p1681_p13, %p1680_p12 }
  0xda   : > { %p1676_p3 = pneg %p1675_p9 }
  0xdc   : > { %p1683_p1 = pnand %p1682_p11, %p1676_p3 }
  0xde   : > { %1686 = shalt.err (!%p1683_p1)
}
  0xdf   : > { %1362 = dma.hbm_to_vmem [thread:$0]  (!%p2498_p6), %s2437_s8, 16, %s382_s13, [#allocation15]  }
  0xe0   : > { %s1687_s7 = scalar_lea.hbm %s2438_s9, 256 }
  0xe1   : > { %p1688_p2 = scmp.ne.s32.totalorder %s2438_s9, %s1687_s7  ;;  %p1694_p1 = scmp.lt.u32.totalorder %s1687_s7, %s2438_s9 }
  0xe3   : > { %p1690_p7 = pnand %p1688_p2, %p2497_p8 }
  0xe5   : > { %p1691_p4 = pneg %p1690_p7 }
  0xe7   : > { %p1696_p10 = pnand %p1694_p1, %p1691_p4 }
  0xe9   : > { %1699 = shalt.err (!%p1696_p10)
}
  0xea   : > { %s1700_s13 = scalar_lea.vmem %s2210_s29, 256  ;;  %p1708_p3 = scmp.lt.s32.totalorder %s2210_s29, %s2210_s29 }
  0xeb   : > { %p1701_p0 = scmp.ne.s32.totalorder %s2210_s29, %s1700_s13  ;;  %p1709_p12 = scmp.lt.s32.totalorder %s1700_s13, %s1700_s13 }
  0xed   : > { %p1703_p5 = pnand %p1701_p0, %p2497_p8  ;;  %p1710_p13 = por %p1709_p12, %p1708_p3 }
  0xef   : > { %p1704_p9 = pneg %p1703_p5 }
  0xf1   : > { %p1711_p11 = pnand %p1710_p13, %p1704_p9 }
  0xf3   : > { %1714 = shalt.err (!%p1711_p11)
}
  0xf4   : > { %1365 = dma.hbm_to_vmem [thread:$0]  (!%p2498_p6), %s2438_s9, 256, %s2210_s29, [#allocation18], %s2500_s1, %s2500_s1, %s2499_s23  }
  0xf5   : > { %s1227_s21 = sshll.u32 %s2107_s11, 4  ;;  %s1271_s27 = sshll.u32 %s1873_s17, 8 }
  0xf6   : > { %s2261_s7 = scalar_lea.hbm %s2429_s0, %s1271_s27  ;;  %s409_s25 = scalar_lea.vmem [#allocation2], %s1227_s21 }
  0xf7   : > { %s418_s10 = sshll.u32 %s409_s25, 4  ;;  %s2501_s18 = sshll.u32 %s2107_s11, 3  ;;  %s2263_s10 = int_to_ptr.vmem [resolvable:$true] %s418_s10 }
  0xf8   : > { %s2267_s15 = scalar_lea.vmem [#allocation7], %s2501_s18  ;;  %s406_s1 = scalar_lea.sflag [#allocation3], %s2107_s11 }
  0xf9   : > { %s459_s23 = sshll.u32 %s2267_s15, 4  ;;  %s1715_s29 = scalar_lea.hbm %s2261_s7, 256  ;;  %s460_s23 = int_to_ptr.vmem [resolvable:$true] %s459_s23 }
  0xfa   : > { %p1716_p8 = scmp.ne.s32.totalorder %s2261_s7, %s1715_s29  ;;  %p2502_p6 = scmp.ne.s32.totalorder %s2495_s3, 0 }
  0xfb   : > { %s1720_s28 = scalar_lea.hbm %s2429_s0, 512  ;;  %p1721_p4 = scmp.lt.u32.totalorder %s2261_s7, %s2429_s0 }
  0xfc   : > { %p1718_p2 = pnand %p1716_p8, %p2502_p6  ;;  %p1722_p1 = scmp.lt.u32.totalorder %s1720_s28, %s1715_s29 }
  0xfd   : > { %p1724_p0 = scmp.lt.u32.totalorder %s1715_s29, %s2261_s7 }
  0xfe   : > { %p1719_p7 = pneg %p1718_p2  ;;  %p1723_p10 = por %p1722_p1, %p1721_p4 }
 0x100   : > { %p1725_p5 = por %p1724_p0, %p1723_p10 }
 0x102   : > { %p1726_p9 = pnand %p1725_p5, %p1719_p7 }
 0x104   : > { %1729 = shalt.err (!%p1726_p9)
}
 0x105   : > { %s1730_s27 = scalar_lea.vmem %s2263_s10, 256  ;;  %s1889_s16 = smov [#allocation2]  }
 0x106   : > { %p1731_p3 = scmp.ne.s32.totalorder %s2263_s10, %s1730_s27  ;;  %s1735_s12 = sshll.u32 %s1889_s16, 4  ;;  %s1736_s12 = int_to_ptr.vmem [resolvable:$false] %s1735_s12 }
 0x107   : > { %s1737_s25 = scalar_lea.vmem %s1736_s12, 512  ;;  %p1738_p11 = scmp.lt.s32.totalorder %s2263_s10, %s1736_s12 }
 0x108   : > { %p1733_p12 = pnand %p1731_p3, %p2502_p6  ;;  %p1739_p8 = scmp.lt.s32.totalorder %s1737_s25, %s1730_s27 }
 0x10a   : > { %p1734_p13 = pneg %p1733_p12  ;;  %p1740_p2 = por %p1739_p8, %p1738_p11 }
 0x10c   : > { %p1741_p4 = pnand %p1740_p2, %p1734_p13 }
 0x10e   : > { %1744 = shalt.err (!%p1741_p4)
}
 0x10f   : > { %s1890_s18 = smov 128   ;;  %s1891_s29 = smov 8  }
 0x110   : > { %p2503_p7 = scmp.ne.s32.totalorder %s2493_s24, 0  ;;  %s1745_s19 = scalar_lea.hbm %s2162_s5, 128 }
 0x111   : > { %p1746_p1 = scmp.ne.s32.totalorder %s2162_s5, %s1745_s19  ;;  %s1750_s22 = scalar_lea.hbm %s2431_s2, 256 }
 0x112   : > { %1369 = dma.hbm_to_vmem [thread:$0]  (!%p2503_p7), %s2261_s7, 256, %s2263_s10, %s406_s1, %s1890_s18, %s1890_s18, %s1891_s29  }
 0x113   : > { %p1748_p10 = pnand %p1746_p1, %p2502_p6  ;;  %p1751_p5 = scmp.lt.u32.totalorder %s2162_s5, %s2431_s2 }
 0x114   : > { %p1752_p9 = scmp.lt.u32.totalorder %s1750_s22, %s1745_s19  ;;  %p1754_p12 = scmp.lt.u32.totalorder %s1745_s19, %s2162_s5 }
 0x115   : > { %p1749_p0 = pneg %p1748_p10 }
 0x116   : > { %p1753_p3 = por %p1752_p9, %p1751_p5 }
 0x118   : > { %p1755_p13 = por %p1754_p12, %p1753_p3 }
 0x11a   : > { %p1756_p11 = pnand %p1755_p13, %p1749_p0 }
 0x11c   : > { %1759 = shalt.err (!%p1756_p11)
}
 0x11d   : > { %s1760_s11 = scalar_lea.vmem %s460_s23, 128  ;;  %s1892_s7 = smov [#allocation7]  }
 0x11e   : > { %p1761_p8 = scmp.ne.s32.totalorder %s460_s23, %s1760_s11  ;;  %s1765_s10 = sshll.u32 %s1892_s7, 4  ;;  %s1766_s10 = int_to_ptr.vmem [resolvable:$false] %s1765_s10 }
 0x11f   : > { %s1767_s15 = scalar_lea.vmem %s1766_s10, 256  ;;  %p1768_p1 = scmp.lt.s32.totalorder %s460_s23, %s1766_s10 }
 0x120   : > { %p1763_p2 = pnand %p1761_p8, %p2502_p6  ;;  %p1769_p10 = scmp.lt.s32.totalorder %s1767_s15, %s1760_s11 }
 0x122   : > { %p1764_p4 = pneg %p1763_p2  ;;  %p1770_p7 = por %p1769_p10, %p1768_p1 }
 0x124   : > { %p1771_p5 = pnand %p1770_p7, %p1764_p4 }
 0x126   : > { %1774 = shalt.err (!%p1771_p5)
}
 0x127   : > { %p2504_p9 = scmp.ne.s32.totalorder %s2493_s24, 0  ;;  %p2505_p0 = scmp.ne.s32.totalorder %s2479_s20, 0 }
 0x128   : > { %s2317_s3 = sand.u32 (!%p2505_p0), 1, %s1861_s14   ;;  %p2506_p6 = scmp.ne.s32.totalorder (!%p2505_p0), %s2487_s26, 0 }
 0x129   : > { %1375 = dma.hbm_to_vmem [thread:$0]  (!%p2504_p9), %s2162_s5, 128, %s460_s23, %s2127_s30  }
 0x12a   : > { %468 = sbr.rel (%p2505_p0) target bundleno = 1170 (0x492), region = 60  ;;  %s1235_s1 = sshll.u32 (!%p2505_p0), %s2317_s3, 4 }
 0x12b   : > { %s471_s16 = scalar_lea.sflag (!%p2505_p0), [#allocation3], %s2317_s3  ;;  %s474_s12 = scalar_lea.vmem (!%p2505_p0), [#allocation2], %s1235_s1 }
 0x131   : > { %1828 = dma.done.wait (%p2506_p6), %s471_s16, 256  }
 0x132   : > { %1830 = vsyncadd (%p2506_p6), %s471_s16, 4294967040  ;;  %s2507_s30 = sld [smem:[#allocation31_spill]]  ;;  %s1236_s24 = sshll.u32 %s2317_s3, 3 }
 0x133   : > { %s483_s23 = scalar_lea.vmem [#allocation5], %s1236_s24 }
 0x138   : > { %s479_s20 = sand.u32 1, %s2507_s30  }
 0x139   : > { %s480_s5 = scalar_lea.sflag [#allocation6], %s479_s20 }
 0x13a   : > { %1832 = dma.done.wait (%p2506_p6), %s480_s5, 256  }
 0x13b   : > { %1834 = vsyncadd (%p2506_p6), %s480_s5, 4294967040  ;;  %s492_s25 = scalar_lea.vmem [#allocation7], %s1236_s24  ;;  %p2508_p7 = scmp.eq.s32.totalorder %s2507_s30, 0 }
 0x13d   : > { %1836 = dma.done.wait (%p2508_p7), [#allocation9], 32   ;;  %p2509_p3 = pmov %p2508_p7 }
 0x13f   : > { %1838 = vsyncadd (%p2509_p3), [#allocation9], 4294967264  ;;  %p2510_p12 = pmov %p2509_p3 }
 0x140   : > { %p2511_p13 = pmov %p2509_p3 }
 0x141   : > { %1840 = dma.done.wait (%p2510_p12), [#allocation12], 512  }
 0x142   : > { %1842 = vsyncadd (%p2511_p13), [#allocation12], 4294966784  ;;  %p2512_p11 = pmov %p2509_p3 }
 0x143   : > { %p2513_p8 = pmov %p2509_p3 }
 0x144   : > { %1844 = dma.done.wait (%p2512_p11), [#allocation15], 144  }
 0x145   : > { %1846 = vsyncadd (%p2513_p8), [#allocation15], 4294967152  ;;  %p2514_p2 = pmov %p2509_p3 }
 0x147   : > { %1848 = dma.done.wait (%p2514_p2), [#allocation18], 256   ;;  %p2515_p4 = pmov %p2514_p2 }
 0x148   : > { %vm574_vm0 = vcmask 261120   ;;  %v570_v0 = vld [vmem:[%s483_s23] sm:$0xff]  ;;  %v572_v1 = vld [vmem:[%s474_s12 + $0x8] sm:$0xff]  ;;  %vm1894_vm1 = vmmov 0   ;;  %s2516_s26 = sld [smem:[#allocation29_spill]]  ;;  %s2517_s18 = sld [smem:[#allocation33_spill]] }
 0x149   : > { %1850 = vsyncadd (%p2515_p4), [#allocation18], 4294967040  ;;  %v571_v2 = vld [vmem:[%s474_s12] sm:$0xff]  ;;  %v575_v3 = vsel %vm574_vm0, %v570_v0, 0.0  ;;  %v581_v4 = vsel %vm574_vm0, %v572_v1, 0.0  ;;  %v573_v5 = vld [vmem:[%s492_s25] sm:$0xff] }
 0x14a   : > { %576 = vadd.xlane.f32.xlu0 %v575_v3  ;;  %582 = vadd.xlane.f32.xlu1 %v581_v4  ;;  %v578_v6 = vsel %vm574_vm0, %v571_v2, 0.0  ;;  %v584_v7 = vsel %vm574_vm0, %v573_v5, 0.0  ;;  %v1459_v28 = vld [vmem:[#allocation11] sm:$0xff]   ;;  %v1460_v29 = vld [vmem:[#allocation13] sm:$0xff]   ;;  %v1461_v30 = vld [vmem:[#allocation11 + $0x8] sm:$0xff]   ;;  %s566_s29 = scalar_lea.vmem [#allocation19], %s1235_s1 }
 0x14b   : > { %1284 = vmatprep.subr.bf16.mxu0 %v1459_v28  ;;  %1292 = vmatprep.subr.bf16.mxu1 %v1460_v29  ;;  %v1462_v31 = vld [vmem:[#allocation13 + $0x8] sm:$0xff]   ;;  %s1017_s19 = sshll.u32 %s566_s29, 4  ;;  %s2518_s21 = sld [smem:[#allocation40_spill]]  ;;  %s2373_s19 = int_to_ptr.vmem [resolvable:$true] %s1017_s19 }
 0x14c   : > { %1285 = vmatpush3.bf16.msra.mxu0 %v1459_v28  ;;  %1293 = vmatpush3.bf16.msra.mxu1 %v1460_v29  ;;  %v1246_v46 = vld [vmem:[#allocation8] ss:$0 sm:$0xff]  ;;  %v1247_v52 = vld [vmem:[#allocation10] ss:$0 sm:$0xff]  ;;  %s1002_s11 = scalar_lea.sflag [#allocation4], %s2317_s3  ;;  %s1775_s7 = scalar_lea.vmem %s2373_s19, 256 }
 0x14d   : > { %1286 = vmatprep.subr.bf16.mxu0 %v1461_v30  ;;  %1294 = vmatprep.subr.bf16.mxu1 %v1462_v31  ;;  %p1776_p1 = scmp.ne.s32.totalorder %s2373_s19, %s1775_s7  ;;  %s1895_s10 = smov [#allocation19]  }
 0x14e   : > { %579 = vadd.xlane.f32.xlu0 %v578_v6  ;;  %585 = vadd.xlane.f32.xlu1 %v584_v7  ;;  %s1272_s13 = sshll.u32 %s2516_s26, 8  ;;  %p2519_p10 = scmp.ne.s32.totalorder %s2517_s18, 0 }
 0x14f   : > { %s1779_s15 = sshll.u32 %s1895_s10, 4  ;;  %s1780_s15 = int_to_ptr.vmem [resolvable:$false] %s1779_s15 }
 0x150   : > { %1287 = vmatpush3.bf16.msra.mxu0 %v1461_v30  ;;  %1295 = vmatpush3.bf16.msra.mxu1 %v1462_v31  ;;  %p1777_p5 = pnand %p1776_p1, %p2519_p10  ;;  %s1781_s1 = scalar_lea.vmem %s1780_s15, 512 }
 0x151   : > { %s2378_s27 = scalar_lea.hbm %s2518_s21, %s1272_s13  ;;  %p1782_p0 = scmp.lt.s32.totalorder %s2373_s19, %s1780_s15 }
 0x152   : > { %p1778_p9 = pneg %p1777_p5  ;;  %p1783_p6 = scmp.lt.s32.totalorder %s1781_s1, %s1775_s7 }
 0x154   : > { %p1784_p7 = por %p1783_p6, %p1782_p0 }
 0x156   : > { %p1785_p3 = pnand %p1784_p7, %p1778_p9 }
 0x1d7   : > { %v577_v8 = vpop.xlane.xlu0 %576  ;;  %v583_v9 = vpop.xlane.xlu1 %582 }
 0x1d8   : > { %v588_v10 = vmul.f32 0.03125, %v577_v8  ;;  %v590_v11 = vmul.f32 0.03125, %v583_v9 }
 0x1da   : > { %v592_v12 = vsub.f32 %v570_v0, %v588_v10  ;;  %v594_v13 = vsub.f32 %v572_v1, %v590_v11  ;;  %v1893_v0 = vmov 0.0   ;;  %v1463_v1 = vld [vmem:[#allocation17] sm:$0xff]  }
 0x1db   : > { %v580_v14 = vpop.xlane.xlu0 %579  ;;  %v586_v15 = vpop.xlane.xlu1 %585  ;;  %1300 = vmatprep.subr.bf16.mxu0 %v1893_v0  ;;  %v853_v29 = vrot.slane %v1893_v0, 6  ;;  %v865_v30 = vrot.slane %v1893_v0, 7 }
 0x1dc   : > { %v589_v16 = vmul.f32 0.03125, %v580_v14  ;;  %v591_v17 = vmul.f32 0.03125, %v586_v15  ;;  %v596_v18 = vmul.f32 %v592_v12, %v592_v12  ;;  %v598_v19 = vmul.f32 %v594_v13, %v594_v13 }
 0x1de   : > { %v593_v20 = vsub.f32 %v571_v2, %v589_v16  ;;  %v595_v21 = vsub.f32 %v573_v5, %v591_v17  ;;  %v600_v22 = vsel %vm574_vm0, %v596_v18, 0.0  ;;  %v606_v23 = vsel %vm574_vm0, %v598_v19, 0.0  ;;  %v1464_v2 = vld [vmem:[#allocation17 + $0x8] sm:$0xff]  }
 0x1df   : > { %601 = vadd.xlane.f32.xlu0 %v600_v22  ;;  %v816_v17 = vlaneseq  ;;  %v889_v22 = vrot.slane %v1893_v0, 1 }
 0x1e0   : > { %v597_v24 = vmul.f32 %v593_v20, %v593_v20  ;;  %v599_v25 = vmul.f32 %v595_v21, %v595_v21 }
 0x1e1   : > { %v817_v18 = vshrl.u32 %v816_v17, 7 }
 0x1e2   : > { %v603_v26 = vsel %vm574_vm0, %v597_v24, 0.0  ;;  %v609_v27 = vsel %vm574_vm0, %v599_v25, 0.0  ;;  %v903_v25 = vrot.slane %v1893_v0, 2 }
 0x1e3   : > { %607 = vadd.xlane.f32.xlu0 %v606_v23  ;;  %604 = vadd.xlane.f32.xlu1 %v603_v26  ;;  %v861_v23 = vsub.s32 0, %v817_v18  ;;  %v873_v24 = vsub.s32 1, %v817_v18  ;;  %vm890_vm2 = vcmp.lt.s32.totalorder %v817_v18, 7  ;;  %v895_v26 = vsub.s32 3, %v817_v18 }
 0x1e4   : > { %vm856_vm3 = vcmp.lt.s32.totalorder %v817_v18, 2  ;;  %vm868_vm4 = vcmp.lt.s32.totalorder %v817_v18, 1  ;;  %vm904_vm5 = vcmp.lt.s32.totalorder %v817_v18, 6 }
 0x1e7   : > { %610 = vadd.xlane.f32.xlu1 %v609_v27  ;;  %v909_v27 = vsub.s32 4, %v817_v18 }
 0x26c   : > { %v602_v32 = vpop.xlane.xlu0 %601 }
 0x26d   : > { %v612_v33 = vmul.f32 0.03125, %v602_v32 }
 0x26f   : > { %v616_v34 = vadd.f32 1e-05, %v612_v33  ;;  %v852_v33 = vld [vmem:[#allocation14] sm:$0x1f] }
 0x270   : > { %v605_v35 = vpop.xlane.xlu1 %604  ;;  %v608_v36 = vpop.xlane.xlu0 %607 }
 0x271   : > { %1465 = vrsqrt.f32 %v616_v34  ;;  %v613_v37 = vmul.f32 0.03125, %v605_v35  ;;  %v614_v38 = vmul.f32 0.03125, %v608_v36  ;;  %v862_v36 = vrot.slane %v852_v33, %v861_v23 }
 0x273   : > { %v617_v39 = vadd.f32 1e-05, %v613_v37  ;;  %v618_v40 = vadd.f32 1e-05, %v614_v38  ;;  %v874_v37 = vrot.slane %v852_v33, %v873_v24 }
 0x274   : > { %v611_v41 = vpop.xlane.xlu1 %610 }
 0x275   : > { %1467 = vrsqrt.f32 %v617_v39  ;;  %v615_v42 = vmul.f32 0.03125, %v611_v41 }
 0x276   : > { %1469 = vrsqrt.f32 %v618_v40 }
 0x277   : > { %v619_v43 = vadd.f32 1e-05, %v615_v42 }
 0x279   : > { %1471 = vrsqrt.f32 %v619_v43 }
 0x27b   : > { %v1466_v44 = vpop.eup %1465 }
 0x27c   : > { %v624_v45 = vmul.f32 %v1466_v44, %v592_v12  ;;  %v896_v44 = vrot.slane %v852_v33, %v895_v26 }
 0x27e   : > { %v635_v50 = vmul.f32 %v1246_v46, %v624_v45 }
 0x27f   : > { %v1468_v47 = vpop.eup %1467 }
 0x280   : > { %v1470_v48 = vpop.eup %1469  ;;  %v625_v49 = vmul.f32 %v1468_v47, %v593_v20  ;;  %v646_v56 = vadd.f32 %v1247_v52, %v635_v50  ;;  %v881_v20 = vsub.s32 2, %v817_v18 }
 0x281   : > { %v626_v51 = vmul.f32 %v1470_v48, %v594_v13 }
 0x282   : > { %v636_v53 = vmul.f32 %v1246_v46, %v625_v49  ;;  %v882_v43 = vrot.slane %v852_v33, %v881_v20 }
 0x283   : > { %v1472_v54 = vpop.eup %1471  ;;  %v637_v58 = vmul.f32 %v1246_v46, %v626_v51 }
 0x284   : > { %v627_v55 = vmul.f32 %v1472_v54, %v595_v21  ;;  %v647_v57 = vadd.f32 %v1247_v52, %v636_v53 }
 0x285   : > { %v648_v61 = vadd.f32 %v1247_v52, %v637_v58 }
 0x286   : > { %v650_v59 = vpack.c.bf16 %v647_v57, %v646_v56  ;;  %v638_v60 = vmul.f32 %v1246_v46, %v627_v55  ;;  %v910_v57 = vrot.slane %v852_v33, %v909_v27 }
 0x288   : > { %1288 = vmatprep.mubr.msk.bf16.mxu0 %vm574_vm0, %v650_v59  ;;  %1296 = vmatprep.mubr.msk.bf16.mxu1 %vm574_vm0, %v650_v59  ;;  %v649_v62 = vadd.f32 %v1247_v52, %v638_v60 }
 0x28a   : > { %v651_v63 = vpack.c.bf16 %v649_v62, %v648_v61 }
 0x28c   : > { %1289 = vmatmul.mubr.msk.bf16.vlgmr.msra.gmra.mrb[0].mxu0 %vm574_vm0, %v651_v63  ;;  %1297 = vmatmul.mubr.msk.bf16.vlgmr.msra.gmra.mrb[0].mxu1 %vm574_vm0, %v651_v63 }
 0x28d   : > { %1304 = vmatprep.mubr.msk.bf16.mxu0 %vm1894_vm1, %v1893_v0  ;;  %1301 = vmatpush3.bf16.msra.mxu0 %v1463_v1 }
 0x28e   : > { %1302 = vmatprep.subr.bf16.mxu0 %v1893_v0 }
 0x291   : > { %1303 = vmatpush3.bf16.msra.mxu0 %v1464_v2 }
 0x35f   : > { %v1290_v3 = vpop.f32.mrb[0].mxu0  ;;  %v1298_v4 = vpop.f32.mrb[0].mxu1 }
 0x360   : > { %v1258_v5 = vmul.f32 -1.442695, %v1298_v4  ;;  %v708_v6 = vpop.f32.mrb[1].mxu0  ;;  %v773_v7 = vpop.f32.mrb[1].mxu1 }
 0x361   : > { %v1291_v8 = vpop.f32.mrb[2].mxu0  ;;  %v1299_v9 = vpop.f32.mrb[2].mxu1  ;;  %v1260_v6 = vld [vmem:[#allocation16] ss:$0 sm:$0xff] }
 0x362   : > { %1473 = vpow2.f32 %v1258_v5  ;;  %v711_v10 = vpop.f32.mrb[3].mxu0  ;;  %v776_v11 = vpop.f32.mrb[3].mxu1 }
 0x363   : > { %v1257_v12 = vmul.f32 -1.442695, %v776_v11 }
 0x365   : > { %1475 = vpow2.f32 %v1257_v12 }
 0x36c   : > { %v1474_v13 = vpop.eup %1473 }
 0x36d   : > { %v802_v14 = vadd.f32 1.0, %v1474_v13 }
 0x36f   : > { %v1476_v15 = vpop.eup %1475  ;;  %1477 = vrcp.f32 %v802_v14 }
 0x370   : > { %v801_v16 = vadd.f32 1.0, %v1476_v15 }
 0x372   : > { %1479 = vrcp.f32 %v801_v16 }
 0x379   : > { %v1478_v19 = vpop.eup %1477 }
 0x37a   : > { %v814_v21 = vmul.f32 %v1478_v19, %v1290_v3 }
 0x37c   : > { %v1480_v28 = vpop.eup %1479  ;;  %v888_v31 = vrot.slane %v814_v21, 1  ;;  %v902_v34 = vrot.slane %v814_v21, 2  ;;  %v855_v35 = vrot.slane %v814_v21, 6  ;;  %v867_v39 = vrot.slane %v814_v21, 7 }
 0x37d   : > { %v813_v32 = vmul.f32 %v1480_v28, %v711_v10  ;;  %v884_v61 = vmul.f32 %v882_v43, %v814_v21 }
 0x37e   : > { %v891_v38 = vsel %vm890_vm2, %v888_v31, %v889_v22  ;;  %v905_v46 = vsel %vm904_vm5, %v902_v34, %v903_v25 }
 0x37f   : > { %v854_v40 = vrot.slane %v813_v32, 6  ;;  %v866_v41 = vrot.slane %v813_v32, 7  ;;  %v887_v42 = vrot.slane %v813_v32, 1  ;;  %v901_v45 = vrot.slane %v813_v32, 2 }
 0x380   : > { %v883_v60 = vmul.f32 %v882_v43, %v813_v32  ;;  %v898_v1 = vmul.f32 %v896_v44, %v891_v38  ;;  %v912_v5 = vmul.f32 %v910_v57, %v905_v46 }
 0x381   : > { %v857_v47 = vsel %vm856_vm3, %v854_v40, %v855_v35  ;;  %v858_v48 = vsel %vm856_vm3, %v853_v29, %v854_v40  ;;  %v869_v49 = vsel %vm868_vm4, %v866_v41, %v867_v39  ;;  %v870_v50 = vsel %vm868_vm4, %v865_v30, %v866_v41 }
 0x382   : > { %v863_v51 = vmul.f32 %v862_v36, %v858_v48  ;;  %v864_v52 = vmul.f32 %v862_v36, %v857_v47  ;;  %v875_v53 = vmul.f32 %v874_v37, %v870_v50  ;;  %v876_v54 = vmul.f32 %v874_v37, %v869_v49 }
 0x383   : > { %v892_v55 = vsel %vm890_vm2, %v887_v42, %v888_v31  ;;  %v906_v56 = vsel %vm904_vm5, %v901_v45, %v902_v34 }
 0x384   : > { %v877_v58 = vadd.f32 %v875_v53, %v863_v51  ;;  %v878_v59 = vadd.f32 %v876_v54, %v864_v52  ;;  %v897_v0 = vmul.f32 %v896_v44, %v892_v55  ;;  %v911_v4 = vmul.f32 %v910_v57, %v906_v56 }
 0x386   : > { %v885_v62 = vadd.f32 %v883_v60, %v877_v58  ;;  %v886_v63 = vadd.f32 %v884_v61, %v878_v59 }
 0x388   : > { %v899_v2 = vadd.f32 %v897_v0, %v885_v62  ;;  %v900_v3 = vadd.f32 %v898_v1, %v886_v63 }
 0x38a   : > { %v913_v7 = vadd.f32 %v911_v4, %v899_v2  ;;  %v914_v8 = vadd.f32 %v912_v5, %v900_v3 }
 0x38c   : > { %v922_v9 = vadd.f32 %v1260_v6, %v913_v7  ;;  %v923_v10 = vadd.f32 %v1260_v6, %v914_v8 }
 0x38e   : > { %v1261_v11 = vmul.f32 -1.442695, %v922_v9  ;;  %v1262_v12 = vmul.f32 -1.442695, %v923_v10 }
 0x390   : > { %1481 = vpow2.f32 %v1261_v11 }
 0x391   : > { %1483 = vpow2.f32 %v1262_v12 }
 0x39a   : > { %v1482_v13 = vpop.eup %1481 }
 0x39b   : > { %v1484_v14 = vpop.eup %1483  ;;  %v930_v15 = vadd.f32 1.0, %v1482_v13 }
 0x39c   : > { %v931_v16 = vadd.f32 1.0, %v1484_v14 }
 0x39d   : > { %1485 = vrcp.f32 %v930_v15 }
 0x39e   : > { %1487 = vrcp.f32 %v931_v16 }
 0x3a7   : > { %v1486_v17 = vpop.eup %1485 }
 0x3a8   : > { %v1488_v18 = vpop.eup %1487  ;;  %v936_v19 = vmul.f32 %v1486_v17, %v922_v9 }
 0x3a9   : > { %v937_v20 = vmul.f32 %v1488_v18, %v923_v10 }
 0x3ab   : > { %v938_v21 = vpack.c.bf16 %v937_v20, %v936_v19 }
 0x3ad   : > { %1305 = vmatmul.mubr.msk.bf16.vlgmr.msra.gmra.mrb[4].mxu0 %vm574_vm0, %v938_v21 }
 0x480   : > { %v992_v22 = vpop.f32.mrb[4].mxu0 }
 0x481   : > { %999 = vst.msk [vmem:[%s566_s29] sm:$0xff] %vm574_vm0, %v992_v22  ;;  %v1306_v23 = vpop.f32.mrb[5].mxu0 }
 0x482   : > { %v995_v24 = vpop.f32.mrb[6].mxu0 }
 0x483   : > { %1000 = vst.msk [vmem:[%s566_s29 + $0x8] sm:$0xff] %vm574_vm0, %v995_v24  ;;  %v1307_v25 = vpop.f32.mrb[7].mxu0 }
 0x484   : > { %1788 = shalt.err (!%p1785_p3)
}
 0x485   : > { %s1789_s16 = scalar_lea.hbm %s2378_s27, 256  ;;  %s1793_s20 = scalar_lea.hbm %s2518_s21, 512 }
 0x486   : > { %p1790_p12 = scmp.ne.s32.totalorder %s2378_s27, %s1789_s16  ;;  %p1794_p8 = scmp.lt.u32.totalorder %s2378_s27, %s2518_s21 }
 0x487   : > { %p1795_p2 = scmp.lt.u32.totalorder %s1793_s20, %s1789_s16  ;;  %p1797_p1 = scmp.lt.u32.totalorder %s1789_s16, %s2378_s27 }
 0x488   : > { %p1791_p13 = pnand %p1790_p12, %p2519_p10 }
 0x489   : > { %p1796_p4 = por %p1795_p2, %p1794_p8 }
 0x48a   : > { %p1792_p11 = pneg %p1791_p13 }
 0x48b   : > { %p1798_p5 = por %p1797_p1, %p1796_p4 }
 0x48d   : > { %p1799_p9 = pnand %p1798_p5, %p1792_p11 }
 0x48f   : > { %1802 = shalt.err (!%p1799_p9)
}
 0x490   : > { %s1896_s23 = smov 128   ;;  %s1897_s25 = smov 8  }
 0x491   : > { %1342 = dma.vmem_to_hbm [thread:$0]  (%p2519_p10), %s2373_s19, 256, %s2378_s27, %s1002_s11, %s1896_s23, %s1896_s23, %s1897_s25  }
 0x492 PF: > { %s2520_s26 = sld [smem:[#allocation27_spill]]  ;;  %s2521_s29 = sld [smem:[#allocation35_spill]] }
 0x493   : > { %s2522_s13 = sld [smem:[#allocation30_spill]] }
 0x498   : > { %s1032_s28 = sand.u32 1, %s2520_s26   ;;  %p2523_p0 = scmp.ne.s32.totalorder %s2521_s29, 0 }
 0x499   : > { %p2524_p6 = scmp.ge.s32.totalorder %s2522_s13, 2  ;;  %s1033_s22 = scalar_lea.sflag [#allocation4], %s1032_s28 }
 0x49b   : > { %p1377_p7 = pnand %p2524_p6, %p2523_p0 }
 0x49d   : > { %1852 = dma.done.wait (!%p1377_p7), %s1033_s22, 256  }
 0x49e   : > { %1854 = vsyncadd (!%p1377_p7), %s1033_s22, 4294967040  ;;  %s33_s18 = sadd.s32 1, %s2522_s13   ;;  %s2525_s7 = sld [smem:[#allocation28_spill]] }
 0x49f   : > { %p30_p3 = scmp.ge.s32.totalorder %s33_s18, 4   ;;  %s2526_s15 = sld [smem:[#allocation34_spill]] }
 0x4a0   : > { %s2527_s3 = sld [smem:[#allocation32_spill]]  ;;  %s2528_s13 = smov %s1861_s14 }
 0x4a1   : > { %s2530_s16 = smov %s1873_s17  ;;  %32 = sbr.rel (!%p30_p3) target bundleno = 18 (0x12), region = 157 }
 0x4a4   : > { %s2529_s14 = smov %s2525_s7 }
 0x4a6   : > { %s2531_s17 = smov %s2527_s3 }
 0x4a8   :  { %1038 = vsyncpa [#allocation3], 1 }
 0x4a9   :  { %1040 = vsyncpa [#allocation3 + $0x1], 1 }
 0x4aa   :  { %1041 = vsyncpa [#allocation6], 1 }
 0x4ab   :  { %1043 = vsyncpa [#allocation6 + $0x1], 1 }
 0x4ac   :  { %1044 = vsyncpa [#allocation9], 1 }
 0x4ad   :  { %1045 = vsyncpa [#allocation12], 1 }
 0x4ae   :  { %1046 = vsyncpa [#allocation15], 1 }
 0x4af   :  { %1047 = vsyncpa [#allocation18], 1 }
 0x4b0   :  { %1048 = vsyncpa [#allocation4], 1 }
 0x4b1   :  { %1050 = vsyncpa [#allocation4 + $0x1], 1 }

// kernel: tpu_custom_call.1
= control target key start
LH: loop header
LB: loop body
LE: loop exit
PB: predicated region body
PF: predicated region fallthrough
CT: control target
= control target key end

     0   :  { %s2076_s0 = inlined_call_operand.hbm [shape: f32[2,16,32], index: 0, kind: input, shape index: {}]   ;;  %s2077_s1 = inlined_call_operand.hbm [shape: f32[2,1,8,32], index: 1, kind: input, shape index: {}]   ;;  %s2078_s2 = inlined_call_operand.hbm [shape: f32[2,1,8,32], index: 2, kind: input, shape index: {}]   ;;  %s2079_s3 = inlined_call_operand.vmem [shape: f32[1,32], index: 3, kind: input, shape index: {}]   ;;  %s2080_s4 = inlined_call_operand.vmem [shape: f32[1,32], index: 4, kind: input, shape index: {}]   ;;  %s2081_s5 = inlined_call_operand.vmem [shape: bf16[32,32], index: 5, kind: input, shape index: {}]   ;;  %s2082_s6 = inlined_call_operand.hbm [shape: bf16[32,32], index: 6, kind: input, shape index: {}]   ;;  %s2083_s7 = inlined_call_operand.hbm [shape: f32[5,32], index: 7, kind: input, shape index: {}]   ;;  %s2084_s8 = inlined_call_operand.hbm [shape: f32[1,32], index: 8, kind: input, shape index: {}]   ;;  %s2085_s9 = inlined_call_operand.vmem [shape: bf16[32,32], index: 9, kind: input, shape index: {}]   ;;  %s2086_s10 = inlined_call_operand.hbm [shape: f32[2,16,32], index: 10, kind: output, shape index: {}]  }
   0x1   :  { %2108 = sst [smem:[#allocation27_spill]] %s2077_s1 }
   0x2   :  { %2109 = sst [smem:[#allocation28_spill]] %s2082_s6 }
   0x3   :  { %2110 = sst [smem:[#allocation29_spill]] %s2085_s9 }
   0x4   :  { %2111 = sst [smem:[#allocation30_spill]] %s2086_s10 }
   0x5   :  { %15 = vsyncpa [#allocation3], 0 }
   0x6   :  { %17 = vsyncpa [#allocation3 + $0x1], 0 }
   0x7   :  { %18 = vsyncpa [#allocation6], 0 }
   0x8   :  { %20 = vsyncpa [#allocation6 + $0x1], 0 }
   0x9   :  { %21 = vsyncpa [#allocation9], 0 }
   0xa   :  { %22 = vsyncpa [#allocation12], 0 }
   0xb   :  { %23 = vsyncpa [#allocation4], 0 }
   0xc   :  { %25 = vsyncpa [#allocation4 + $0x1], 0  ;;  %s1689_s13 = smov 0   ;;  %s1691_s14 = smov 0  }
   0xd   :  { %s1693_s15 = smov 0   ;;  %s1695_s16 = smov 0  }
   0xe   :  { %s1697_s17 = smov 0   ;;  %s1699_s18 = smov 0  }
   0xf LB: > { %2112 = sst [smem:[#allocation19_spill]] %s1597_s13  ;;  %s1720_s19 = sadd.s32 4294967295, %s1617_s18   ;;  %s1617_s18 = sphi %s1699_s18, %s31_s18   ;;  %s1613_s17 = sphi %s1697_s17, %s2158_s17   ;;  %s1609_s16 = sphi %s1695_s16, %s2157_s16   ;;  %s1605_s15 = sphi %s1693_s15, %s2153_s15   ;;  %s1601_s14 = sphi %s1691_s14, %s2156_s14   ;;  %s1597_s13 = sphi %s1689_s13, %s2155_s13  }
  0x10   : > { %2113 = sst [smem:[#allocation20_spill]] %s1605_s15  ;;  %s1125_s20 = sadd.s32 4294967294, %s1617_s18  }
  0x11   : > { %2114 = sst [smem:[#allocation21_spill]] %s1609_s16  ;;  %p65_p0 = scmp.ne.s32.totalorder %s1601_s14, %s1597_s13 }
  0x12   : > { %2115 = sst [smem:[#allocation22_spill]] %s1617_s18  ;;  %p2088_p1 = scmp.eq.s32.totalorder %s1720_s19, 0 }
  0x13   : > { %p300_p3 = scmp.eq.s32.totalorder %s1125_s20, 1  ;;  %p1126_p5 = scmp.ge.s32.totalorder %s1617_s18, 1 }
  0x14   : > { %p1729_p4 = por %p2088_p1, %p65_p0  ;;  %p307_p7 = scmp.lt.s32.totalorder %s1617_s18, 3 }
  0x15   : > { %p1734_p6 = por %p300_p3, %p65_p0  ;;  %s1619_s24 = smov [#allocation8]  }
  0x16   : > { %s2116_s21 = scalar_select %p1729_p4, 1, 0 }
  0x17   : > { %s2117_s22 = scalar_select %p1734_p6, 1, 0 }
  0x18   : > { %p1739_p8 = pnand %p1126_p5, %p307_p7  ;;  %s328_s25 = sshll.u32 %s1619_s24, 4  ;;  %s329_s25 = int_to_ptr.vmem [resolvable:$true] %s328_s25 }
  0x19   : > { %2118 = sst [smem:[#allocation23_spill]] %s2117_s22  ;;  %s43_s27 = sadd.s32 1, %s1613_s17 }
  0x1a   : > { %s2119_s23 = scalar_select %p1739_p8, 1, 0 }
  0x1b   : > { %p1228_p9 = pneg %p1739_p8  ;;  %s2121_s6 = sld [smem:[#allocation28_spill]] }
  0x1d   : > { %p1748_p11 = pnand %p1228_p9, %p2088_p1 }
  0x1f   : > { %s2120_s26 = scalar_select %p1748_p11, 1, 0 }
  0x20   : > { %p1761_p13 = pneg %p1748_p11 }
  0x21   : > { %s1349_s30 = scalar_lea.hbm %s2121_s6, 256 }
  0x22   : > { %p1350_p12 = scmp.ne.s32.totalorder %s2121_s6, %s1349_s30  ;;  %p1356_p5 = scmp.lt.u32.totalorder %s1349_s30, %s2121_s6 }
  0x23   : > { %s2122_s20 = scalar_select %p1761_p13, 1, 0 }
  0x24   : > { %p1352_p0 = pnand %p1761_p13, %p1350_p12 }
  0x26   : > { %p1353_p3 = pneg %p1352_p0 }
  0x28   : > { %p1358_p7 = pnand %p1356_p5, %p1353_p3 }
  0x2a   : > { %1361 = shalt.err (!%p1358_p7)
}
  0x2b   : > { %s1362_s28 = scalar_lea.vmem %s329_s25, 256  ;;  %p1370_p2 = scmp.lt.s32.totalorder %s329_s25, %s329_s25 }
  0x2c   : > { %p1363_p9 = scmp.ne.s32.totalorder %s329_s25, %s1362_s28  ;;  %p1371_p6 = scmp.lt.s32.totalorder %s1362_s28, %s1362_s28 }
  0x2e   : > { %p1365_p10 = pnand %p1363_p9, %p1761_p13  ;;  %p1372_p4 = por %p1371_p6, %p1370_p2 }
  0x30   : > { %p1366_p1 = pneg %p1365_p10 }
  0x32   : > { %p1373_p8 = pnand %p1372_p4, %p1366_p1 }
  0x34   : > { %1376 = shalt.err (!%p1373_p8)
}
  0x35   : > { %s1620_s29 = smov 64   ;;  %s1621_s22 = smov 4  }
  0x36   : > { %1231 = dma.hbm_to_vmem [thread:$0]  (!%p1748_p11), %s2121_s6, 256, %s329_s25, [#allocation9], %s1620_s29, %s1620_s29, %s1621_s22  }
  0x37   : > { %p45_p1 = scmp.ge.s32.totalorder %s43_s27, 2  ;;  %s52_s12 = sadd.s32 1, %s1605_s15 }
  0x38   : > { %p59_p2 = scmp.ne.s32.totalorder %s1605_s15, %s1601_s14  ;;  %p60_p4 = scmp.eq.s32.totalorder %s1617_s18, 0 }
  0x39   : > { %s2160_s27 = smov (%p45_p1, %s43_s27), 0  ;;  %p2124_p8 = scmp.eq.s32.totalorder %s1720_s19, 1 }
  0x3a   : > { %2123 = sst [smem:[#allocation24_spill]] %s2160_s27  ;;  %p61_p6 = por %p60_p4, %p59_p2 }
  0x3b   : > { %p1785_p10 = por %p2124_p8, %p59_p2  ;;  %s47_s28 = ssub.s32 %s1613_s17, %s2160_s27 }
  0x3c   : > { %p1255_p12 = scmp.lt.s32.totalorder %s1617_s18, 2  ;;  %p50_p0 = scmp.eq.s32.totalorder %s47_s28, 0 }
  0x3d   : > { %s2125_s24 = scalar_select %p1785_p10, 1, 0 }
  0x3e   : > { %s1793_s13 = sand.u32 1, %s1605_s15   ;;  %p1795_p3 = pnand %p1255_p12, %p61_p6 }
  0x3f   : > { %2126 = sst [smem:[#allocation25_spill]] %s2125_s24  ;;  %s390_s29 = sand.u32 1, %s1617_s18  }
  0x40   : > { %s2127_s25 = scalar_select %p1795_p3, 1, 0 }
  0x41   : > { %s1801_s22 = scalar_select %p50_p0, %s1605_s15, %s52_s12  }
  0x42   : > { %s2099_s30 = sshll.u32 %s1793_s13, 3  ;;  %s1135_s11 = sshll.u32 %s1613_s17, 7 }
  0x43   : > { %2128 = sst [smem:[#allocation26_spill]] %s1801_s22  ;;  %s2129_s1 = sld [smem:[#allocation27_spill]] }
  0x44   : > { %s394_s28 = scalar_lea.vmem [#allocation5], %s2099_s30  ;;  %s1817_s12 = scalar_lea.hbm %s2078_s2, %s1135_s11 }
  0x45   : > { %s402_s24 = sshll.u32 %s394_s28, 4  ;;  %s1819_s22 = scalar_lea.sflag [#allocation6], %s390_s29  ;;  %s1812_s24 = int_to_ptr.vmem [resolvable:$true] %s402_s24 }
  0x46   : > { %p1825_p7 = pneg %p1795_p3 }
  0x49   : > { %s1808_s27 = scalar_lea.hbm %s2129_s1, %s1135_s11  ;;  %s1382_s30 = scalar_lea.hbm %s2129_s1, 256 }
  0x4a   : > { %s1377_s15 = scalar_lea.hbm %s1808_s27, 128  ;;  %p1383_p2 = scmp.lt.u32.totalorder %s1808_s27, %s2129_s1 }
  0x4b   : > { %p1378_p5 = scmp.ne.s32.totalorder %s1808_s27, %s1377_s15  ;;  %p1384_p4 = scmp.lt.u32.totalorder %s1382_s30, %s1377_s15 }
  0x4c   : > { %p1386_p8 = scmp.lt.u32.totalorder %s1377_s15, %s1808_s27 }
  0x4d   : > { %p1380_p9 = pnand %p1825_p7, %p1378_p5  ;;  %p1385_p6 = por %p1384_p4, %p1383_p2 }
  0x4f   : > { %p1381_p1 = pneg %p1380_p9  ;;  %p1387_p12 = por %p1386_p8, %p1385_p6 }
  0x51   : > { %p1388_p0 = pnand %p1387_p12, %p1381_p1 }
  0x53   : > { %1391 = shalt.err (!%p1388_p0)
}
  0x54   : > { %s1392_s29 = scalar_lea.vmem %s1812_s24, 128  ;;  %s1622_s11 = smov [#allocation5]  }
  0x55   : > { %p1393_p5 = scmp.ne.s32.totalorder %s1812_s24, %s1392_s29  ;;  %s1397_s10 = sshll.u32 %s1622_s11, 4  ;;  %s1398_s10 = int_to_ptr.vmem [resolvable:$false] %s1397_s10 }
  0x56   : > { %s1399_s28 = scalar_lea.vmem %s1398_s10, 256  ;;  %p1400_p11 = scmp.lt.s32.totalorder %s1812_s24, %s1398_s10 }
  0x57   : > { %p1395_p9 = pnand %p1393_p5, %p1825_p7  ;;  %p1401_p13 = scmp.lt.s32.totalorder %s1399_s28, %s1392_s29 }
  0x59   : > { %p1396_p10 = pneg %p1395_p9  ;;  %p1402_p2 = por %p1401_p13, %p1400_p11 }
  0x5b   : > { %p1403_p4 = pnand %p1402_p2, %p1396_p10 }
  0x5d   : > { %1406 = shalt.err (!%p1403_p4)
}
  0x5e   : > { %1244 = dma.hbm_to_vmem [thread:$0]  (!%p1795_p3), %s1808_s27, 128, %s1812_s24, %s1819_s22  }
  0x5f   : > { %s1623_s15 = smov [#allocation10]   ;;  %s1624_s16 = smov [#allocation11]  }
  0x60   : > { %s342_s30 = sshll.u32 %s1623_s15, 4  ;;  %s353_s18 = sshll.u32 %s1624_s16, 4  ;;  %s343_s30 = int_to_ptr.vmem [resolvable:$true] %s342_s30  ;;  %s1849_s18 = int_to_ptr.vmem [resolvable:$true] %s353_s18 }
  0x61   : > { %s1407_s29 = scalar_lea.hbm %s2083_s7, 128  ;;  %p2131_p13 = scmp.ne.s32.totalorder %s2122_s20, 0 }
  0x62   : > { %p1408_p11 = scmp.ne.s32.totalorder %s2083_s7, %s1407_s29  ;;  %p1414_p6 = scmp.lt.u32.totalorder %s1407_s29, %s2083_s7 }
  0x64   : > { %p1410_p10 = pnand %p1408_p11, %p2131_p13 }
  0x66   : > { %p1411_p1 = pneg %p1410_p10 }
  0x68   : > { %p1416_p8 = pnand %p1414_p6, %p1411_p1 }
  0x6a   : > { %1419 = shalt.err (!%p1416_p8)
}
  0x6b   : > { %s1420_s24 = scalar_lea.vmem %s343_s30, 128  ;;  %p1428_p9 = scmp.lt.s32.totalorder %s343_s30, %s343_s30 }
  0x6c   : > { %p1421_p12 = scmp.ne.s32.totalorder %s343_s30, %s1420_s24  ;;  %p1429_p2 = scmp.lt.s32.totalorder %s1420_s24, %s1420_s24 }
  0x6e   : > { %p1423_p0 = pnand %p1421_p12, %p2131_p13  ;;  %p1430_p4 = por %p1429_p2, %p1428_p9 }
  0x70   : > { %p1424_p5 = pneg %p1423_p0 }
  0x72   : > { %p1431_p3 = pnand %p1430_p4, %p1424_p5 }
  0x74   : > { %1434 = shalt.err (!%p1431_p3)
}
  0x75   : > { %p2132_p11 = scmp.ne.s32.totalorder %s2120_s26, 0  ;;  %s1435_s11 = scalar_lea.hbm %s2084_s8, 16 }
  0x76   : > { %p1436_p10 = scmp.ne.s32.totalorder %s2084_s8, %s1435_s11  ;;  %p1442_p3 = scmp.lt.u32.totalorder %s1435_s11, %s2084_s8 }
  0x77   : > { %1234 = dma.hbm_to_vmem [thread:$0]  (!%p2132_p11), %s2083_s7, 128, %s343_s30, [#allocation9]  }
  0x78   : > { %p1438_p1 = pnand %p1436_p10, %p2131_p13 }
  0x7a   : > { %p1439_p6 = pneg %p1438_p1 }
  0x7c   : > { %p1444_p8 = pnand %p1442_p3, %p1439_p6 }
  0x7e   : > { %1447 = shalt.err (!%p1444_p8)
}
  0x7f   : > { %s1448_s30 = scalar_lea.vmem %s1849_s18, 16  ;;  %s1455_s24 = scalar_lea.vmem %s1849_s18, 32 }
  0x80   : > { %p1449_p12 = scmp.ne.s32.totalorder %s1849_s18, %s1448_s30  ;;  %p1456_p9 = scmp.lt.s32.totalorder %s1849_s18, %s1849_s18 }
  0x81   : > { %p1457_p2 = scmp.lt.s32.totalorder %s1455_s24, %s1448_s30 }
  0x82   : > { %p1451_p0 = pnand %p1449_p12, %p2131_p13 }
  0x83   : > { %p1458_p4 = por %p1457_p2, %p1456_p9 }
  0x84   : > { %p1452_p5 = pneg %p1451_p0 }
  0x86   : > { %p1459_p10 = pnand %p1458_p4, %p1452_p5 }
  0x88   : > { %1462 = shalt.err (!%p1459_p10)
}
  0x89   : > { %1237 = dma.hbm_to_vmem [thread:$0]  (!%p2132_p11), %s2084_s8, 16, %s1849_s18, [#allocation12]  }
  0x8a   : > { %s1131_s20 = sshll.u32 %s1793_s13, 4  ;;  %s1171_s9 = sshll.u32 %s1613_s17, 8 }
  0x8b   : > { %s1898_s10 = scalar_lea.hbm %s2076_s0, %s1171_s9  ;;  %s371_s26 = scalar_lea.vmem [#allocation2], %s1131_s20 }
  0x8c   : > { %s380_s29 = sshll.u32 %s371_s26, 4  ;;  %s2133_s28 = sshll.u32 %s1793_s13, 3  ;;  %s1900_s29 = int_to_ptr.vmem [resolvable:$true] %s380_s29 }
  0x8d   : > { %s1904_s27 = scalar_lea.vmem [#allocation7], %s2133_s28  ;;  %s368_s30 = scalar_lea.sflag [#allocation3], %s1793_s13 }
  0x8e   : > { %s421_s18 = sshll.u32 %s1904_s27, 4  ;;  %s1463_s24 = scalar_lea.hbm %s1898_s10, 256  ;;  %s422_s18 = int_to_ptr.vmem [resolvable:$true] %s421_s18 }
  0x8f   : > { %p1464_p13 = scmp.ne.s32.totalorder %s1898_s10, %s1463_s24  ;;  %s1468_s9 = scalar_lea.hbm %s2076_s0, 512 }
  0x90   : > { %p1469_p6 = scmp.lt.u32.totalorder %s1898_s10, %s2076_s0  ;;  %p1470_p3 = scmp.lt.u32.totalorder %s1468_s9, %s1463_s24 }
  0x91   : > { %p1466_p11 = pnand %p1464_p13, %p1825_p7  ;;  %p1472_p12 = scmp.lt.u32.totalorder %s1463_s24, %s1898_s10 }
  0x92   : > { %p1471_p8 = por %p1470_p3, %p1469_p6 }
  0x93   : > { %p1467_p1 = pneg %p1466_p11 }
  0x94   : > { %p1473_p0 = por %p1472_p12, %p1471_p8 }
  0x96   : > { %p1474_p5 = pnand %p1473_p0, %p1467_p1 }
  0x98   : > { %1477 = shalt.err (!%p1474_p5)
}
  0x99   : > { %s1478_s11 = scalar_lea.vmem %s1900_s29, 256  ;;  %s1625_s26 = smov [#allocation2]  }
  0x9a   : > { %p1479_p9 = scmp.ne.s32.totalorder %s1900_s29, %s1478_s11  ;;  %s1483_s28 = sshll.u32 %s1625_s26, 4  ;;  %s1484_s28 = int_to_ptr.vmem [resolvable:$false] %s1483_s28 }
  0x9b   : > { %s1485_s1 = scalar_lea.vmem %s1484_s28, 512  ;;  %p1486_p10 = scmp.lt.s32.totalorder %s1900_s29, %s1484_s28 }
  0x9c   : > { %p1481_p2 = pnand %p1479_p9, %p1825_p7  ;;  %p1487_p13 = scmp.lt.s32.totalorder %s1485_s1, %s1478_s11 }
  0x9e   : > { %p1482_p4 = pneg %p1481_p2  ;;  %p1488_p11 = por %p1487_p13, %p1486_p10 }
  0xa0   : > { %p1489_p6 = pnand %p1488_p11, %p1482_p4 }
  0xa2   : > { %1492 = shalt.err (!%p1489_p6)
}
  0xa3   : > { %s1626_s24 = smov 128   ;;  %s1627_s15 = smov 8  }
  0xa4   : > { %p2134_p1 = scmp.ne.s32.totalorder %s2127_s25, 0  ;;  %s1493_s9 = scalar_lea.hbm %s1817_s12, 128 }
  0xa5   : > { %p1494_p3 = scmp.ne.s32.totalorder %s1817_s12, %s1493_s9  ;;  %s1498_s11 = scalar_lea.hbm %s2078_s2, 256 }
  0xa6   : > { %1241 = dma.hbm_to_vmem [thread:$0]  (!%p2134_p1), %s1898_s10, 256, %s1900_s29, %s368_s30, %s1626_s24, %s1626_s24, %s1627_s15  }
  0xa7   : > { %p1496_p8 = pnand %p1494_p3, %p1825_p7  ;;  %p1499_p0 = scmp.lt.u32.totalorder %s1817_s12, %s2078_s2 }
  0xa8   : > { %p1500_p5 = scmp.lt.u32.totalorder %s1498_s11, %s1493_s9  ;;  %p1502_p2 = scmp.lt.u32.totalorder %s1493_s9, %s1817_s12 }
  0xa9   : > { %p1497_p12 = pneg %p1496_p8 }
  0xaa   : > { %p1501_p9 = por %p1500_p5, %p1499_p0 }
  0xac   : > { %p1503_p4 = por %p1502_p2, %p1501_p9 }
  0xae   : > { %p1504_p10 = pnand %p1503_p4, %p1497_p12 }
  0xb0   : > { %1507 = shalt.err (!%p1504_p10)
}
  0xb1   : > { %s1508_s13 = scalar_lea.vmem %s422_s18, 128  ;;  %s1628_s10 = smov [#allocation7]  }
  0xb2   : > { %p1509_p13 = scmp.ne.s32.totalorder %s422_s18, %s1508_s13  ;;  %s1513_s29 = sshll.u32 %s1628_s10, 4  ;;  %s1514_s29 = int_to_ptr.vmem [resolvable:$false] %s1513_s29 }
  0xb3   : > { %s1515_s27 = scalar_lea.vmem %s1514_s29, 256  ;;  %p1516_p3 = scmp.lt.s32.totalorder %s422_s18, %s1514_s29 }
  0xb4   : > { %p1511_p11 = pnand %p1509_p13, %p1825_p7  ;;  %p1517_p8 = scmp.lt.s32.totalorder %s1515_s27, %s1508_s13 }
  0xb6   : > { %p1512_p6 = pneg %p1511_p11  ;;  %p1518_p1 = por %p1517_p8, %p1516_p3 }
  0xb8   : > { %p1519_p0 = pnand %p1518_p1, %p1512_p6 }
  0xba   : > { %1522 = shalt.err (!%p1519_p0)
}
  0xbb   : > { %p2135_p5 = scmp.ne.s32.totalorder %s2127_s25, 0  ;;  %p2136_p12 = scmp.ne.s32.totalorder %s2119_s23, 0 }
  0xbc   : > { %s1954_s6 = sand.u32 (!%p2136_p12), 1, %s1601_s14   ;;  %p2137_p7 = scmp.ne.s32.totalorder (!%p2136_p12), %s2116_s21, 0 }
  0xbd   : > { %1247 = dma.hbm_to_vmem [thread:$0]  (!%p2135_p5), %s1817_s12, 128, %s422_s18, %s1819_s22  }
  0xbe   : > { %430 = sbr.rel (%p2136_p12) target bundleno = 1049 (0x419), region = 60  ;;  %s1139_s30 = sshll.u32 (!%p2136_p12), %s1954_s6, 4 }
  0xbf   : > { %s433_s1 = scalar_lea.sflag (!%p2136_p12), [#allocation3], %s1954_s6  ;;  %s436_s24 = scalar_lea.vmem (!%p2136_p12), [#allocation2], %s1139_s30 }
  0xc5   : > { %1576 = dma.done.wait (%p2137_p7), %s433_s1, 256  }
  0xc6   : > { %1578 = vsyncadd (%p2137_p7), %s433_s1, 4294967040  ;;  %s441_s23 = sand.u32 1, %s1720_s19   ;;  %s1140_s25 = sshll.u32 %s1954_s6, 3 }
  0xc7   : > { %s442_s22 = scalar_lea.sflag [#allocation6], %s441_s23  ;;  %s445_s12 = scalar_lea.vmem [#allocation5], %s1140_s25 }
  0xc8   : > { %1580 = dma.done.wait (%p2137_p7), %s442_s22, 256  }
  0xc9   : > { %1582 = vsyncadd (%p2137_p7), %s442_s22, 4294967040  ;;  %s454_s18 = scalar_lea.vmem [#allocation7], %s1140_s25  ;;  %p2138_p1 = scmp.eq.s32.totalorder %s1720_s19, 0 }
  0xcb   : > { %1584 = dma.done.wait (%p2138_p1), [#allocation9], 384   ;;  %p2139_p9 = pmov %p2138_p1 }
  0xcc   : > { %p2140_p2 = pmov %p2138_p1 }
  0xcd   : > { %1586 = vsyncadd (%p2139_p9), [#allocation9], 4294966912 }
  0xce   : > { %1588 = dma.done.wait (%p2140_p2), [#allocation12], 16   ;;  %p2141_p4 = pmov %p2138_p1 }
  0xcf   : > { %vm520_vm0 = vcmask 261120   ;;  %v516_v0 = vld [vmem:[%s445_s12] sm:$0xff]  ;;  %v518_v1 = vld [vmem:[%s436_s24 + $0x8] sm:$0xff]  ;;  %s2142_s10 = sld [smem:[#allocation29_spill]]  ;;  %vm1630_vm1 = vmmov 0   ;;  %s2143_s1 = sld [smem:[#allocation21_spill]] }
  0xd0   : > { %1590 = vsyncadd (%p2141_p4), [#allocation12], 4294967280  ;;  %v517_v2 = vld [vmem:[%s436_s24] sm:$0xff]  ;;  %v521_v3 = vsel %vm520_vm0, %v516_v0, 0.0  ;;  %v527_v4 = vsel %vm520_vm0, %v518_v1, 0.0  ;;  %v519_v5 = vld [vmem:[%s454_s18] sm:$0xff] }
  0xd1   : > { %522 = vadd.xlane.f32.xlu0 %v521_v3  ;;  %528 = vadd.xlane.f32.xlu1 %v527_v4  ;;  %v524_v6 = vsel %vm520_vm0, %v517_v2, 0.0  ;;  %v530_v7 = vsel %vm520_vm0, %v519_v5, 0.0  ;;  %v1319_v28 = vld [vmem:[%s2081_s5] sm:$0xff]   ;;  %v1321_v30 = vld [vmem:[%s2081_s5 + $0x8] sm:$0xff]   ;;  %s2144_s24 = sld [smem:[#allocation25_spill]]  ;;  %s512_s23 = scalar_lea.vmem [#allocation13], %s1139_s30 }
  0xd2   : > { %v1320_v29 = vld [vmem:[#allocation8] sm:$0xff]   ;;  %1184 = vmatprep.subr.bf16.mxu0 %v1319_v28  ;;  %v1322_v31 = vld [vmem:[#allocation8 + $0x8] sm:$0xff]   ;;  %s963_s25 = sshll.u32 %s512_s23, 4  ;;  %s2145_s19 = sld [smem:[#allocation30_spill]]  ;;  %s2020_s25 = int_to_ptr.vmem [resolvable:$true] %s963_s25 }
  0xd3   : > { %1192 = vmatprep.subr.bf16.mxu1 %v1320_v29  ;;  %1185 = vmatpush3.bf16.msra.mxu0 %v1319_v28  ;;  %v1146_v46 = vld [vmem:[%s2079_s3] ss:$0 sm:$0xff]  ;;  %s948_s30 = scalar_lea.sflag [#allocation4], %s1954_s6  ;;  %s1523_s15 = scalar_lea.vmem %s2020_s25, 256 }
  0xd4   : > { %1193 = vmatpush3.bf16.msra.mxu1 %v1320_v29  ;;  %1186 = vmatprep.subr.bf16.mxu0 %v1321_v30  ;;  %v1147_v52 = vld [vmem:[%s2080_s4] ss:$0 sm:$0xff]  ;;  %p1524_p10 = scmp.ne.s32.totalorder %s2020_s25, %s1523_s15  ;;  %s1631_s9 = smov [#allocation13]  }
  0xd5   : > { %525 = vadd.xlane.f32.xlu0 %v524_v6  ;;  %531 = vadd.xlane.f32.xlu1 %v530_v7  ;;  %s1172_s22 = sshll.u32 %s2143_s1, 8  ;;  %s1527_s16 = sshll.u32 %s1631_s9, 4  ;;  %s1528_s16 = int_to_ptr.vmem [resolvable:$false] %s1527_s16 }
  0xd6   : > { %1194 = vmatprep.subr.bf16.mxu1 %v1322_v31  ;;  %s1529_s20 = scalar_lea.vmem %s1528_s16, 512  ;;  %p1530_p3 = scmp.lt.s32.totalorder %s2020_s25, %s1528_s16 }
  0xd7   : > { %1187 = vmatpush3.bf16.msra.mxu0 %v1321_v30  ;;  %p2146_p13 = scmp.ne.s32.totalorder %s2144_s24, 0  ;;  %p1531_p8 = scmp.lt.s32.totalorder %s1529_s20, %s1523_s15 }
  0xd8   : > { %1195 = vmatpush3.bf16.msra.mxu1 %v1322_v31  ;;  %s2025_s21 = scalar_lea.hbm %s2145_s19, %s1172_s22 }
  0xd9   : > { %p1525_p11 = pnand %p1524_p10, %p2146_p13  ;;  %p1532_p0 = por %p1531_p8, %p1530_p3 }
  0xdb   : > { %p1526_p6 = pneg %p1525_p11 }
  0xdd   : > { %p1533_p5 = pnand %p1532_p0, %p1526_p6 }
 0x15e   : > { %v523_v8 = vpop.xlane.xlu0 %522  ;;  %v529_v9 = vpop.xlane.xlu1 %528 }
 0x15f   : > { %v534_v10 = vmul.f32 0.03125, %v523_v8  ;;  %v536_v11 = vmul.f32 0.03125, %v529_v9 }
 0x161   : > { %v538_v12 = vsub.f32 %v516_v0, %v534_v10  ;;  %v540_v13 = vsub.f32 %v518_v1, %v536_v11  ;;  %v1629_v0 = vmov 0.0   ;;  %v1323_v1 = vld [vmem:[%s2142_s10] sm:$0xff]  }
 0x162   : > { %v526_v14 = vpop.xlane.xlu0 %525  ;;  %v532_v15 = vpop.xlane.xlu1 %531  ;;  %1200 = vmatprep.subr.bf16.mxu0 %v1629_v0  ;;  %v799_v29 = vrot.slane %v1629_v0, 6  ;;  %v811_v30 = vrot.slane %v1629_v0, 7 }
 0x163   : > { %v535_v16 = vmul.f32 0.03125, %v526_v14  ;;  %v537_v17 = vmul.f32 0.03125, %v532_v15  ;;  %v542_v18 = vmul.f32 %v538_v12, %v538_v12  ;;  %v544_v19 = vmul.f32 %v540_v13, %v540_v13 }
 0x165   : > { %v539_v20 = vsub.f32 %v517_v2, %v535_v16  ;;  %v541_v21 = vsub.f32 %v519_v5, %v537_v17  ;;  %v546_v22 = vsel %vm520_vm0, %v542_v18, 0.0  ;;  %v552_v23 = vsel %vm520_vm0, %v544_v19, 0.0  ;;  %v1324_v2 = vld [vmem:[%s2142_s10 + $0x8] sm:$0xff]  }
 0x166   : > { %547 = vadd.xlane.f32.xlu0 %v546_v22  ;;  %v762_v17 = vlaneseq  ;;  %v835_v22 = vrot.slane %v1629_v0, 1 }
 0x167   : > { %v543_v24 = vmul.f32 %v539_v20, %v539_v20  ;;  %v545_v25 = vmul.f32 %v541_v21, %v541_v21 }
 0x168   : > { %v763_v18 = vshrl.u32 %v762_v17, 7 }
 0x169   : > { %v549_v26 = vsel %vm520_vm0, %v543_v24, 0.0  ;;  %v555_v27 = vsel %vm520_vm0, %v545_v25, 0.0  ;;  %v849_v25 = vrot.slane %v1629_v0, 2 }
 0x16a   : > { %553 = vadd.xlane.f32.xlu0 %v552_v23  ;;  %550 = vadd.xlane.f32.xlu1 %v549_v26  ;;  %v807_v23 = vsub.s32 0, %v763_v18  ;;  %v819_v24 = vsub.s32 1, %v763_v18  ;;  %vm836_vm2 = vcmp.lt.s32.totalorder %v763_v18, 7  ;;  %v841_v26 = vsub.s32 3, %v763_v18 }
 0x16b   : > { %vm802_vm3 = vcmp.lt.s32.totalorder %v763_v18, 2  ;;  %vm814_vm4 = vcmp.lt.s32.totalorder %v763_v18, 1  ;;  %vm850_vm5 = vcmp.lt.s32.totalorder %v763_v18, 6 }
 0x16e   : > { %556 = vadd.xlane.f32.xlu1 %v555_v27  ;;  %v855_v27 = vsub.s32 4, %v763_v18 }
 0x1f3   : > { %v548_v32 = vpop.xlane.xlu0 %547 }
 0x1f4   : > { %v558_v33 = vmul.f32 0.03125, %v548_v32 }
 0x1f6   : > { %v562_v34 = vadd.f32 1e-05, %v558_v33  ;;  %v798_v33 = vld [vmem:[#allocation10] sm:$0x1f] }
 0x1f7   : > { %v551_v35 = vpop.xlane.xlu1 %550  ;;  %v554_v36 = vpop.xlane.xlu0 %553 }
 0x1f8   : > { %1325 = vrsqrt.f32 %v562_v34  ;;  %v559_v37 = vmul.f32 0.03125, %v551_v35  ;;  %v560_v38 = vmul.f32 0.03125, %v554_v36  ;;  %v808_v36 = vrot.slane %v798_v33, %v807_v23 }
 0x1fa   : > { %v563_v39 = vadd.f32 1e-05, %v559_v37  ;;  %v564_v40 = vadd.f32 1e-05, %v560_v38  ;;  %v820_v37 = vrot.slane %v798_v33, %v819_v24 }
 0x1fb   : > { %v557_v41 = vpop.xlane.xlu1 %556 }
 0x1fc   : > { %1327 = vrsqrt.f32 %v563_v39  ;;  %v561_v42 = vmul.f32 0.03125, %v557_v41 }
 0x1fd   : > { %1329 = vrsqrt.f32 %v564_v40 }
 0x1fe   : > { %v565_v43 = vadd.f32 1e-05, %v561_v42 }
 0x200   : > { %1331 = vrsqrt.f32 %v565_v43 }
 0x202   : > { %v1326_v44 = vpop.eup %1325 }
 0x203   : > { %v570_v45 = vmul.f32 %v1326_v44, %v538_v12  ;;  %v842_v44 = vrot.slane %v798_v33, %v841_v26 }
 0x205   : > { %v581_v50 = vmul.f32 %v1146_v46, %v570_v45 }
 0x206   : > { %v1328_v47 = vpop.eup %1327 }
 0x207   : > { %v1330_v48 = vpop.eup %1329  ;;  %v571_v49 = vmul.f32 %v1328_v47, %v539_v20  ;;  %v592_v56 = vadd.f32 %v1147_v52, %v581_v50  ;;  %v827_v20 = vsub.s32 2, %v763_v18 }
 0x208   : > { %v572_v51 = vmul.f32 %v1330_v48, %v540_v13 }
 0x209   : > { %v582_v53 = vmul.f32 %v1146_v46, %v571_v49  ;;  %v828_v43 = vrot.slane %v798_v33, %v827_v20 }
 0x20a   : > { %v1332_v54 = vpop.eup %1331  ;;  %v583_v58 = vmul.f32 %v1146_v46, %v572_v51 }
 0x20b   : > { %v573_v55 = vmul.f32 %v1332_v54, %v541_v21  ;;  %v593_v57 = vadd.f32 %v1147_v52, %v582_v53 }
 0x20c   : > { %v594_v61 = vadd.f32 %v1147_v52, %v583_v58 }
 0x20d   : > { %v596_v59 = vpack.c.bf16 %v593_v57, %v592_v56  ;;  %v584_v60 = vmul.f32 %v1146_v46, %v573_v55  ;;  %v856_v57 = vrot.slane %v798_v33, %v855_v27 }
 0x20f   : > { %1188 = vmatprep.mubr.msk.bf16.mxu0 %vm520_vm0, %v596_v59  ;;  %1196 = vmatprep.mubr.msk.bf16.mxu1 %vm520_vm0, %v596_v59  ;;  %v595_v62 = vadd.f32 %v1147_v52, %v584_v60 }
 0x211   : > { %v597_v63 = vpack.c.bf16 %v595_v62, %v594_v61 }
 0x213   : > { %1189 = vmatmul.mubr.msk.bf16.vlgmr.msra.gmra.mrb[0].mxu0 %vm520_vm0, %v597_v63  ;;  %1197 = vmatmul.mubr.msk.bf16.vlgmr.msra.gmra.mrb[0].mxu1 %vm520_vm0, %v597_v63 }
 0x214   : > { %1204 = vmatprep.mubr.msk.bf16.mxu0 %vm1630_vm1, %v1629_v0  ;;  %1201 = vmatpush3.bf16.msra.mxu0 %v1323_v1 }
 0x215   : > { %1202 = vmatprep.subr.bf16.mxu0 %v1629_v0 }
 0x218   : > { %1203 = vmatpush3.bf16.msra.mxu0 %v1324_v2 }
 0x2e6   : > { %v1190_v3 = vpop.f32.mrb[0].mxu0  ;;  %v1198_v4 = vpop.f32.mrb[0].mxu1 }
 0x2e7   : > { %v1158_v5 = vmul.f32 -1.442695, %v1198_v4  ;;  %v654_v6 = vpop.f32.mrb[1].mxu0  ;;  %v719_v7 = vpop.f32.mrb[1].mxu1 }
 0x2e8   : > { %v1191_v8 = vpop.f32.mrb[2].mxu0  ;;  %v1199_v9 = vpop.f32.mrb[2].mxu1  ;;  %v1160_v6 = vld [vmem:[#allocation11] ss:$0 sm:$0xff] }
 0x2e9   : > { %1333 = vpow2.f32 %v1158_v5  ;;  %v657_v10 = vpop.f32.mrb[3].mxu0  ;;  %v722_v11 = vpop.f32.mrb[3].mxu1 }
 0x2ea   : > { %v1157_v12 = vmul.f32 -1.442695, %v722_v11 }
 0x2ec   : > { %1335 = vpow2.f32 %v1157_v12 }
 0x2f3   : > { %v1334_v13 = vpop.eup %1333 }
 0x2f4   : > { %v748_v14 = vadd.f32 1.0, %v1334_v13 }
 0x2f6   : > { %v1336_v15 = vpop.eup %1335  ;;  %1337 = vrcp.f32 %v748_v14 }
 0x2f7   : > { %v747_v16 = vadd.f32 1.0, %v1336_v15 }
 0x2f9   : > { %1339 = vrcp.f32 %v747_v16 }
 0x300   : > { %v1338_v19 = vpop.eup %1337 }
 0x301   : > { %v760_v21 = vmul.f32 %v1338_v19, %v1190_v3 }
 0x303   : > { %v1340_v28 = vpop.eup %1339  ;;  %v834_v31 = vrot.slane %v760_v21, 1  ;;  %v848_v34 = vrot.slane %v760_v21, 2  ;;  %v801_v35 = vrot.slane %v760_v21, 6  ;;  %v813_v39 = vrot.slane %v760_v21, 7 }
 0x304   : > { %v759_v32 = vmul.f32 %v1340_v28, %v657_v10  ;;  %v830_v61 = vmul.f32 %v828_v43, %v760_v21 }
 0x305   : > { %v837_v38 = vsel %vm836_vm2, %v834_v31, %v835_v22  ;;  %v851_v46 = vsel %vm850_vm5, %v848_v34, %v849_v25 }
 0x306   : > { %v800_v40 = vrot.slane %v759_v32, 6  ;;  %v812_v41 = vrot.slane %v759_v32, 7  ;;  %v833_v42 = vrot.slane %v759_v32, 1  ;;  %v847_v45 = vrot.slane %v759_v32, 2 }
 0x307   : > { %v829_v60 = vmul.f32 %v828_v43, %v759_v32  ;;  %v844_v1 = vmul.f32 %v842_v44, %v837_v38  ;;  %v858_v5 = vmul.f32 %v856_v57, %v851_v46 }
 0x308   : > { %v803_v47 = vsel %vm802_vm3, %v800_v40, %v801_v35  ;;  %v804_v48 = vsel %vm802_vm3, %v799_v29, %v800_v40  ;;  %v815_v49 = vsel %vm814_vm4, %v812_v41, %v813_v39  ;;  %v816_v50 = vsel %vm814_vm4, %v811_v30, %v812_v41 }
 0x309   : > { %v809_v51 = vmul.f32 %v808_v36, %v804_v48  ;;  %v810_v52 = vmul.f32 %v808_v36, %v803_v47  ;;  %v821_v53 = vmul.f32 %v820_v37, %v816_v50  ;;  %v822_v54 = vmul.f32 %v820_v37, %v815_v49 }
 0x30a   : > { %v838_v55 = vsel %vm836_vm2, %v833_v42, %v834_v31  ;;  %v852_v56 = vsel %vm850_vm5, %v847_v45, %v848_v34 }
 0x30b   : > { %v823_v58 = vadd.f32 %v821_v53, %v809_v51  ;;  %v824_v59 = vadd.f32 %v822_v54, %v810_v52  ;;  %v843_v0 = vmul.f32 %v842_v44, %v838_v55  ;;  %v857_v4 = vmul.f32 %v856_v57, %v852_v56 }
 0x30d   : > { %v831_v62 = vadd.f32 %v829_v60, %v823_v58  ;;  %v832_v63 = vadd.f32 %v830_v61, %v824_v59 }
 0x30f   : > { %v845_v2 = vadd.f32 %v843_v0, %v831_v62  ;;  %v846_v3 = vadd.f32 %v844_v1, %v832_v63 }
 0x311   : > { %v859_v7 = vadd.f32 %v857_v4, %v845_v2  ;;  %v860_v8 = vadd.f32 %v858_v5, %v846_v3 }
 0x313   : > { %v868_v9 = vadd.f32 %v1160_v6, %v859_v7  ;;  %v869_v10 = vadd.f32 %v1160_v6, %v860_v8 }
 0x315   : > { %v1161_v11 = vmul.f32 -1.442695, %v868_v9  ;;  %v1162_v12 = vmul.f32 -1.442695, %v869_v10 }
 0x317   : > { %1341 = vpow2.f32 %v1161_v11 }
 0x318   : > { %1343 = vpow2.f32 %v1162_v12 }
 0x321   : > { %v1342_v13 = vpop.eup %1341 }
 0x322   : > { %v1344_v14 = vpop.eup %1343  ;;  %v876_v15 = vadd.f32 1.0, %v1342_v13 }
 0x323   : > { %v877_v16 = vadd.f32 1.0, %v1344_v14 }
 0x324   : > { %1345 = vrcp.f32 %v876_v15 }
 0x325   : > { %1347 = vrcp.f32 %v877_v16 }
 0x32e   : > { %v1346_v17 = vpop.eup %1345 }
 0x32f   : > { %v1348_v18 = vpop.eup %1347  ;;  %v882_v19 = vmul.f32 %v1346_v17, %v868_v9 }
 0x330   : > { %v883_v20 = vmul.f32 %v1348_v18, %v869_v10 }
 0x332   : > { %v884_v21 = vpack.c.bf16 %v883_v20, %v882_v19 }
 0x334   : > { %1205 = vmatmul.mubr.msk.bf16.vlgmr.msra.gmra.mrb[4].mxu0 %vm520_vm0, %v884_v21 }
 0x407   : > { %v938_v22 = vpop.f32.mrb[4].mxu0 }
 0x408   : > { %945 = vst.msk [vmem:[%s512_s23] sm:$0xff] %vm520_vm0, %v938_v22  ;;  %v1206_v23 = vpop.f32.mrb[5].mxu0 }
 0x409   : > { %v941_v24 = vpop.f32.mrb[6].mxu0 }
 0x40a   : > { %946 = vst.msk [vmem:[%s512_s23 + $0x8] sm:$0xff] %vm520_vm0, %v941_v24  ;;  %v1207_v25 = vpop.f32.mrb[7].mxu0 }
 0x40b   : > { %1536 = shalt.err (!%p1533_p5)
}
 0x40c   : > { %s1537_s11 = scalar_lea.hbm %s2025_s21, 256  ;;  %s1541_s13 = scalar_lea.hbm %s2145_s19, 512 }
 0x40d   : > { %p1538_p12 = scmp.ne.s32.totalorder %s2025_s21, %s1537_s11  ;;  %p1542_p9 = scmp.lt.u32.totalorder %s2025_s21, %s2145_s19 }
 0x40e   : > { %p1543_p2 = scmp.lt.u32.totalorder %s1541_s13, %s1537_s11  ;;  %p1545_p10 = scmp.lt.u32.totalorder %s1537_s11, %s2025_s21 }
 0x40f   : > { %p1539_p7 = pnand %p1538_p12, %p2146_p13 }
 0x410   : > { %p1544_p4 = por %p1543_p2, %p1542_p9 }
 0x411   : > { %p1540_p1 = pneg %p1539_p7 }
 0x412   : > { %p1546_p11 = por %p1545_p10, %p1544_p4 }
 0x414   : > { %p1547_p6 = pnand %p1546_p11, %p1540_p1 }
 0x416   : > { %1550 = shalt.err (!%p1547_p6)
}
 0x417   : > { %s1632_s1 = smov 128   ;;  %s1633_s23 = smov 8  }
 0x418   : > { %1226 = dma.vmem_to_hbm [thread:$0]  (%p2146_p13), %s2020_s25, 256, %s2025_s21, %s948_s30, %s1632_s1, %s1632_s1, %s1633_s23  }
 0x419 PF: > { %s2147_s22 = sld [smem:[#allocation19_spill]]  ;;  %s2148_s12 = sld [smem:[#allocation23_spill]] }
 0x41a   : > { %s2149_s18 = sld [smem:[#allocation22_spill]] }
 0x41f   : > { %s978_s15 = sand.u32 1, %s2147_s22   ;;  %p2150_p3 = scmp.ne.s32.totalorder %s2148_s12, 0 }
 0x420   : > { %p2151_p8 = scmp.ge.s32.totalorder %s2149_s18, 2  ;;  %s979_s9 = scalar_lea.sflag [#allocation4], %s978_s15 }
 0x422   : > { %p1249_p0 = pnand %p2151_p8, %p2150_p3 }
 0x424   : > { %1592 = dma.done.wait (!%p1249_p0), %s979_s9, 256  }
 0x425   : > { %1594 = vsyncadd (!%p1249_p0), %s979_s9, 4294967040  ;;  %s31_s18 = sadd.s32 1, %s2149_s18   ;;  %s2152_s16 = sld [smem:[#allocation20_spill]] }
 0x426   : > { %p28_p5 = scmp.ge.s32.totalorder %s31_s18, 4   ;;  %s2153_s15 = sld [smem:[#allocation26_spill]] }
 0x427   : > { %s2154_s6 = sld [smem:[#allocation24_spill]]  ;;  %s2155_s13 = smov %s1601_s14 }
 0x428   :  { %30 = sbr.rel (!%p28_p5) target bundleno = 15 (0xf), region = 141 }
 0x42b   : > { %s2156_s14 = smov %s2152_s16  ;;  %s2157_s16 = smov %s1613_s17 }
 0x42d   : > { %s2158_s17 = smov %s2154_s6 }
 0x42f   :  { %984 = vsyncpa [#allocation3], 1 }
 0x430   :  { %986 = vsyncpa [#allocation3 + $0x1], 1 }
 0x431   :  { %987 = vsyncpa [#allocation6], 1 }
 0x432   :  { %989 = vsyncpa [#allocation6 + $0x1], 1 }
 0x433   :  { %990 = vsyncpa [#allocation9], 1 }
 0x434   :  { %991 = vsyncpa [#allocation12], 1 }
 0x435   :  { %992 = vsyncpa [#allocation4], 1 }
 0x436   :  { %994 = vsyncpa [#allocation4 + $0x1], 1 }

</bundles_post_ra>
